<compile_context>
chip_gen: v6e
topology: v6e:2x2x1
jax: 0.10.0
libtpu: 0.0.40
codegen_flags: <defaults>
</compile_context>

<pallas_src>
import math

import jax
import jax.numpy as jnp
from jax.experimental import pallas as pl
from jax.experimental.pallas import tpu as pltpu

# ----------------- configuration (matches SAModule semantics) -----------------
RATIO = 0.5          # SAModule ratio
RADIUS = 0.6         # SAModule r
MAX_NEIGHBORS = 64   # radius(..., max_num_neighbors=64)
C_IN = 4             # per-point feature channels of x
HIDDEN = 32          # nn = Linear(C_IN+3, 32) -> ReLU -> Linear(32, 64) -> ReLU
C_OUT = 64
BLOCK_M = 128        # centers per grid step; sweep 128-512 for large point clouds


def _round_up(a, b):
    return ((a + b - 1) // b) * b


# ----------------------------- Pallas kernel ---------------------------------
def sa_kernel(uj_ref, vc_ref, mask_ref, w2_ref, b2_ref, out_ref):
    """Per block of TM sampled centers:
         h1  = relu(u_j - v_i)        (== relu([x_j, pos_j - pos_i] @ W1 + b1))
         h2  = relu(h1 @ W2 + b2)     (per edge, MXU in bf16, f32 accumulate)
         out = max over valid neighbors of h2 (mask-multiply + sublane reduce)
    """
    tm, K, H1 = uj_ref.shape
    # Elementwise math in f32 (v5e-safe); only the matmul operands are bf16.
    uj = uj_ref[...].astype(jnp.float32)               # [TM, K, 32]
    vc = vc_ref[...]                                    # [TM, 32] f32
    h1 = jnp.maximum(uj - vc[:, None, :], 0.0)          # first Linear + ReLU
    h1 = h1.reshape(tm * K, H1).astype(jnp.bfloat16)    # leading-dim merge: free
    h2 = jnp.dot(h1, w2_ref[...],
                 preferred_element_type=jnp.float32)    # [TM*K, 64] on the MXU
    h2 = jnp.maximum(h2 + b2_ref[...], 0.0)             # second Linear + ReLU
    H2 = h2.shape[-1]
    # Mask-multiply instead of where(-1e30): every real center has >= 1 valid
    # neighbor (itself) and h2 >= 0 after ReLU, so max(valid ∪ {0}) == max(valid).
    # Padded / all-invalid rows simply produce 0 and are sliced off by the caller.
    h2 = h2.reshape(tm, K, H2) * mask_ref[...][:, :, None]
    out_ref[...] = jnp.max(h2, axis=1)


def pointnet_conv_max(u_edges, vc, mask, w2, b2, *, block_m=BLOCK_M):
    """u_edges: [M, K, H1] bf16 gathered per-edge hidden features (bias folded in),
       vc:      [M, H1]   f32 per-center offset (pos_i @ W1p),
       mask:    [M, K]    f32 validity mask,
       w2: [H1, H2] bf16, b2: [1, H2] f32.
       Returns [M, H2] f32."""
    M, K, H1 = u_edges.shape
    H2 = w2.shape[1]

    M8 = _round_up(max(M, 8), 8)
    TM = min(block_m, M8)
    # Keep >= 2 grid steps when possible so v7x can shard across its 2 TensorCores.
    if M8 // TM < 2 and M8 >= 16:
        TM = _round_up(M8 // 2, 8)
    Mp = _round_up(M, TM)

    if Mp != M:
        pad = Mp - M
        u_edges = jnp.pad(u_edges, ((0, pad), (0, 0), (0, 0)))
        vc = jnp.pad(vc, ((0, pad), (0, 0)))
        mask = jnp.pad(mask, ((0, pad), (0, 0)))   # all-zero mask -> output row 0

    out = pl.pallas_call(
        sa_kernel,
        out_shape=jax.ShapeDtypeStruct((Mp, H2), jnp.float32),
        grid_spec=pltpu.PrefetchScalarGridSpec(
            num_scalar_prefetch=0,
            grid=(Mp // TM,),
            in_specs=[
                pl.BlockSpec((TM, K, H1), lambda i: (i, 0, 0)),   # u_edges (bf16)
                pl.BlockSpec((TM, H1), lambda i: (i, 0)),         # vc
                pl.BlockSpec((TM, K), lambda i: (i, 0)),          # mask
                pl.BlockSpec((H1, H2), lambda i: (0, 0)),         # w2 (bf16)
                pl.BlockSpec((1, H2), lambda i: (0, 0)),          # b2
            ],
            out_specs=pl.BlockSpec((TM, H2), lambda i: (i, 0)),
        ),
        compiler_params=pltpu.CompilerParams(
            dimension_semantics=("parallel",),
            vmem_limit_bytes=48 * 1024 * 1024,   # within v7x's 64 MiB/core VMEM
        ),
    )(u_edges, vc, mask, w2, b2)
    # TODO(synk): the [Mp, 64] output tile is only 64 lanes wide (masked stores);
    # it is <1% of the kernel's traffic, so the lane-dense (Mp//2, 128) reshape
    # was skipped to keep the kernel simple.
    return out[:M]


# ------------------------------ JAX glue --------------------------------------
def fps_single(pos_b, m):
    """Farthest point sampling of m points from pos_b [n, 3].
    Deterministic start at index 0 (torch_geometric's fps uses a random start)."""
    n = pos_b.shape[0]
    idx0 = jnp.zeros((m,), jnp.int32)
    dist0 = jnp.full((n,), jnp.inf, dtype=jnp.float32)

    def body(i, state):
        idx, dist = state
        last = pos_b[idx[i - 1]]
        d = jnp.sum((pos_b - last) ** 2, axis=-1)
        dist = jnp.minimum(dist, d)
        nxt = jnp.argmax(dist).astype(jnp.int32)
        idx = idx.at[i].set(nxt)
        return idx, dist

    idx, _ = jax.lax.fori_loop(1, m, body, (idx0, dist0))
    return idx


def radius_neighbors(pos, batch, pos_c, batch_c, r, k):
    """For each center, up to k points of `pos` within radius r and same batch
    (dense [M, k] index + validity mask). Includes the center itself.
    TODO(synk): dense [M, N] distances + argsort is fine for small demo sizes but
    should become a masked top-k / compaction (or a Pallas kernel) for large N."""
    N = pos.shape[0]
    d2 = jnp.sum((pos_c[:, None, :] - pos[None, :, :]) ** 2, axis=-1)  # [M, N]
    valid = (d2 <= r * r) & (batch_c[:, None] == batch[None, :])
    key = jnp.where(valid, jnp.arange(N, dtype=jnp.int32)[None, :], N)
    order = jnp.argsort(key, axis=1)
    nbr_idx = order[:, :k]
    nbr_valid = jnp.take_along_axis(valid, order, axis=1)[:, :k]
    return nbr_idx, nbr_valid.astype(jnp.float32)


def sa_module_forward(x, pos, batch, params, *, B, n_per,
                      ratio=RATIO, r=RADIUS, k=MAX_NEIGHBORS):
    """Mirrors SAModule.forward: returns (x_out, pos_out, batch_out)."""
    # --- idx = fps(pos, batch, ratio) ---
    m_per = int(math.ceil(ratio * n_per))
    pos_by_batch = pos.reshape(B, n_per, 3)
    idx_local = jax.vmap(lambda p: fps_single(p, m_per))(pos_by_batch)  # [B, m_per]
    idx = (idx_local + (jnp.arange(B, dtype=jnp.int32) * n_per)[:, None]).reshape(-1)

    pos_c = pos[idx]          # [M, 3]
    batch_c = batch[idx]      # [M]

    # --- row, col = radius(pos, pos[idx], r, batch, batch[idx], max_num_neighbors=64) ---
    nbr_idx, nbr_mask = radius_neighbors(pos, batch, pos_c, batch_c, r, k)  # [M, K]

    # --- first Linear folded to per-POINT work (linearity of the concat):
    #     [x_j, pos_j - pos_i] @ W1 + b1 = (x_j@W1x + pos_j@W1p + b1) - pos_i@W1p
    # so no [M, K, C_IN+3] concat / per-edge first matmul is ever materialized.
    w1, b1, w2, b2 = params
    w1x, w1p = w1[:C_IN], w1[C_IN:]
    u = (x @ w1x + pos @ w1p + b1).astype(jnp.float32)     # [N, HIDDEN] per point
    vc = (pos_c @ w1p).astype(jnp.float32)                 # [M, HIDDEN] per center

    # gather per-edge hidden features in bf16 (halves the dominant DMA stream)
    u_edges = u.astype(jnp.bfloat16)[nbr_idx]              # [M, K, HIDDEN]

    # --- per-edge MLP (2nd layer) + masked max aggregation (Pallas kernel) ---
    x_out = pointnet_conv_max(u_edges, vc, nbr_mask,
                              w2.astype(jnp.bfloat16),
                              b2.astype(jnp.float32))       # [M, C_OUT]

    # TODO(synk): torch_geometric fps uses a random start point per batch; here
    # the start is deterministic (index 0), so the exact sampled subset may differ.
    return x_out, pos_c, batch_c


# ------------------------------- main -----------------------------------------
if __name__ == "__main__":
    key = jax.random.PRNGKey(0)
    k_pos, k_x, k_w1, k_b1, k_w2, k_b2 = jax.random.split(key, 6)

    B, n_per = 2, 32
    N = B * n_per

    pos = jax.random.uniform(k_pos, (N, 3), dtype=jnp.float32)
    x = jax.random.normal(k_x, (N, C_IN), dtype=jnp.float32)
    batch = jnp.repeat(jnp.arange(B, dtype=jnp.int32), n_per)

    C1 = C_IN + 3
    params = (
        0.2 * jax.random.normal(k_w1, (C1, HIDDEN), dtype=jnp.float32),
        0.05 * jax.random.normal(k_b1, (1, HIDDEN), dtype=jnp.float32),
        0.2 * jax.random.normal(k_w2, (HIDDEN, C_OUT), dtype=jnp.float32),
        0.05 * jax.random.normal(k_b2, (1, C_OUT), dtype=jnp.float32),
    )

    x_out, pos_out, batch_out = sa_module_forward(
        x, pos, batch, params, B=B, n_per=n_per)
    jax.block_until_ready((x_out, pos_out, batch_out))

    assert x_out.shape == (B * int(math.ceil(RATIO * n_per)), C_OUT)
    assert pos_out.shape == (x_out.shape[0], 3)
    assert batch_out.shape == (x_out.shape[0],)
    print("KERNEL_OK")
</pallas_src>

<mosaic_0001>
module attributes {stable_mosaic.version = 11 : i64} {
  func.func @sa_kernel(%arg0: i32, %arg1: memref<16x64x32xbf16, #tpu.memory_space<vmem>>, %arg2: memref<16x32xf32, #tpu.memory_space<vmem>>, %arg3: memref<16x64xf32, #tpu.memory_space<vmem>>, %arg4: memref<32x64xbf16, #tpu.memory_space<vmem>>, %arg5: memref<1x64xf32, #tpu.memory_space<vmem>>, %arg6: memref<16x64xf32, #tpu.memory_space<vmem>>) attributes {dimension_semantics = [#tpu.dimension_semantics<parallel>], iteration_bounds = array<i64: 2>, scalar_prefetch = 0 : i64, scratch_operands = 0 : i64, tpu.core_type = #tpu.core_type<tc>, window_params = [{transform_indices = @transform_0, window_bounds = array<i64: 16, 64, 32>}, {transform_indices = @transform_1, window_bounds = array<i64: 16, 32>}, {transform_indices = @transform_2, window_bounds = array<i64: 16, 64>}, {pipeline_mode = #tpu.pipeline_mode<synchronous>, transform_indices = @transform_3, window_bounds = array<i64: 32, 64>}, {pipeline_mode = #tpu.pipeline_mode<synchronous>, transform_indices = @transform_4, window_bounds = array<i64: 1, 64>}, {transform_indices = @transform_5, window_bounds = array<i64: 16, 64>}]} {
    %c0 = arith.constant 0 : index
    %c0_0 = arith.constant 0 : index
    %c0_1 = arith.constant 0 : index
    %0 = vector.load %arg1[%c0, %c0_0, %c0_1] : memref<16x64x32xbf16, #tpu.memory_space<vmem>>, vector<16x64x32xbf16>
    %1 = arith.extf %0 : vector<16x64x32xbf16> to vector<16x64x32xf32>
    %c0_2 = arith.constant 0 : index
    %c0_3 = arith.constant 0 : index
    %2 = vector.load %arg2[%c0_2, %c0_3] : memref<16x32xf32, #tpu.memory_space<vmem>>, vector<16x32xf32>
    %3 = vector.shape_cast %2 : vector<16x32xf32> to vector<16x1x32xf32>
    %4 = vector.broadcast %3 : vector<16x1x32xf32> to vector<16x64x32xf32>
    %5 = arith.subf %1, %4 : vector<16x64x32xf32>
    %cst = arith.constant 0.000000e+00 : f32
    %6 = vector.broadcast %cst : f32 to vector<16x64x32xf32>
    %7 = arith.maximumf %5, %6 : vector<16x64x32xf32>
    %8 = vector.shape_cast %7 : vector<16x64x32xf32> to vector<1024x32xf32>
    %9 = arith.truncf %8 : vector<1024x32xf32> to vector<1024x32xbf16>
    %c0_4 = arith.constant 0 : index
    %c0_5 = arith.constant 0 : index
    %10 = vector.load %arg4[%c0_4, %c0_5] : memref<32x64xbf16, #tpu.memory_space<vmem>>, vector<32x64xbf16>
    %cst_6 = arith.constant dense<0.000000e+00> : vector<1024x64xf32>
    %11 = tpu.matmul %9, %10, %cst_6 {dimension_numbers = #tpu.dot_dimension_numbers<[1], [0], [0], [1], [0, 0, 1, 1], [], []>} : vector<1024x32xbf16>, vector<32x64xbf16>, vector<1024x64xf32> -> vector<1024x64xf32>
    %c0_7 = arith.constant 0 : index
    %c0_8 = arith.constant 0 : index
    %12 = vector.load %arg5[%c0_7, %c0_8] : memref<1x64xf32, #tpu.memory_space<vmem>>, vector<1x64xf32>
    %13 = vector.broadcast %12 : vector<1x64xf32> to vector<1024x64xf32>
    %14 = arith.addf %11, %13 : vector<1024x64xf32>
    %cst_9 = arith.constant 0.000000e+00 : f32
    %15 = vector.broadcast %cst_9 : f32 to vector<1024x64xf32>
    %16 = arith.maximumf %14, %15 : vector<1024x64xf32>
    %17 = vector.shape_cast %16 : vector<1024x64xf32> to vector<16x64x64xf32>
    %c0_10 = arith.constant 0 : index
    %c0_11 = arith.constant 0 : index
    %18 = vector.load %arg3[%c0_10, %c0_11] : memref<16x64xf32, #tpu.memory_space<vmem>>, vector<16x64xf32>
    %19 = vector.shape_cast %18 : vector<16x64xf32> to vector<16x64x1xf32>
    %20 = vector.broadcast %19 : vector<16x64x1xf32> to vector<16x64x64xf32>
    %21 = arith.mulf %17, %20 : vector<16x64x64xf32>
    %cst_12 = arith.constant dense<0xFF800000> : vector<16x64xf32>
    %22 = vector.multi_reduction <maximumf>, %21, %cst_12 [1] : vector<16x64x64xf32> to vector<16x64xf32>
    %c0_13 = arith.constant 0 : index
    %c0_14 = arith.constant 0 : index
    %23 = vector.load %arg6[%c0_13, %c0_14] : memref<16x64xf32, #tpu.memory_space<vmem>>, vector<16x64xf32>
    tpu.vector_store %arg6[%c0_13, %c0_14], %22 {strides = array<i32>} : memref<16x64xf32, #tpu.memory_space<vmem>>, vector<16x64xf32>,
    return
  }
  func.func @transform_0(%arg0: i32) -> (i32, i32, i32) {
    %c0_i32 = arith.constant 0 : i32
    %c0_i32_0 = arith.constant 0 : i32
    %c0_i32_1 = arith.constant 0 : i32
    return %arg0, %c0_i32, %c0_i32_0 : i32, i32, i32
  }
  func.func @transform_1(%arg0: i32) -> (i32, i32) {
    %c0_i32 = arith.constant 0 : i32
    %c0_i32_0 = arith.constant 0 : i32
    return %arg0, %c0_i32 : i32, i32
  }
  func.func @transform_2(%arg0: i32) -> (i32, i32) {
    %c0_i32 = arith.constant 0 : i32
    %c0_i32_0 = arith.constant 0 : i32
    return %arg0, %c0_i32 : i32, i32
  }
  func.func @transform_3(%arg0: i32) -> (i32, i32) {
    %c0_i32 = arith.constant 0 : i32
    %c0_i32_0 = arith.constant 0 : i32
    %c0_i32_1 = arith.constant 0 : i32
    return %c0_i32, %c0_i32_0 : i32, i32
  }
  func.func @transform_4(%arg0: i32) -> (i32, i32) {
    %c0_i32 = arith.constant 0 : i32
    %c0_i32_0 = arith.constant 0 : i32
    %c0_i32_1 = arith.constant 0 : i32
    return %c0_i32, %c0_i32_0 : i32, i32
  }
  func.func @transform_5(%arg0: i32) -> (i32, i32) {
    %c0_i32 = arith.constant 0 : i32
    %c0_i32_0 = arith.constant 0 : i32
    return %arg0, %c0_i32 : i32, i32
  }
}

</mosaic_0001>

<bundles_post_ra>
// kernel: tpu_custom_call.1
= control target key start
LH: loop header
LB: loop body
LE: loop exit
PB: predicated region body
PF: predicated region fallthrough
CT: control target
= control target key end

     0   :  { %10 = vsyncpa [#allocation3], 0  ;;  %s5527_s0 = inlined_call_operand.vmem [shape: bf16[32,64,32], index: 0, kind: input, shape index: {}]   ;;  %s5528_s1 = inlined_call_operand.vmem [shape: f32[32,32], index: 1, kind: input, shape index: {}]   ;;  %s5529_s2 = inlined_call_operand.vmem [shape: f32[32,64], index: 2, kind: input, shape index: {}]   ;;  %s5530_s3 = inlined_call_operand.vmem [shape: bf16[32,64], index: 3, kind: input, shape index: {}]   ;;  %s5531_s4 = inlined_call_operand.vmem [shape: f32[1,64], index: 4, kind: input, shape index: {}]   ;;  %s5532_s5 = inlined_call_operand.hbm [shape: f32[32,64], index: 5, kind: output, shape index: {}]  }
   0x1   :  { %12 = vsyncpa [#allocation3 + $0x1], 0  ;;  %s3840_s18 = smov 0   ;;  %s3842_s19 = smov 0  }
   0x2   :  { %s3844_s20 = smov 0   ;;  %s3846_s21 = smov 0  }
   0x3 LB: > { %s3861_s22 = sadd.s32 4294967295, %s3804_s21   ;;  %s3089_s23 = sadd.s32 4294967294, %s3804_s21   ;;  %s3804_s21 = sphi %s3846_s21, %s5683_s21   ;;  %s3800_s20 = sphi %s3844_s20, %s5682_s20   ;;  %s3796_s19 = sphi %s3842_s19, %s5681_s19   ;;  %s3792_s18 = sphi %s3840_s18, %s5680_s18  }
   0x4   : > { %s3865_s24 = sadd.s32 1, %s3804_s21   ;;  %s145_s25 = sadd.s32 1, %s3800_s20 }
   0x5   : > { %s142_s26 = ssub.s32 %s3804_s21, %s3865_s24  ;;  %p155_p0 = scmp.ne.s32.totalorder %s3800_s20, %s3796_s19 }
   0x6   : > { %p143_p1 = scmp.eq.s32.totalorder %s142_s26, 0  ;;  %p156_p2 = scmp.eq.s32.totalorder %s3861_s22, 1 }
   0x7   : > { %p161_p3 = scmp.ne.s32.totalorder %s3796_s19, %s3792_s18  ;;  %p162_p4 = scmp.eq.s32.totalorder %s3089_s23, 1 }
   0x8   : > { %s3876_s27 = scalar_select %p143_p1, %s3800_s20, %s145_s25  }
   0x9   : > { %p3878_p5 = por %p156_p2, %p155_p0  ;;  %p3882_p6 = por %p162_p4, %p161_p3 }
   0xa   : > { %p3092_p7 = scmp.ge.s32.totalorder %s3804_s21, 1  ;;  %p214_p8 = scmp.lt.s32.totalorder %s3804_s21, 3 }
   0xc   : > { %p215_p9 = pnand %p3092_p7, %p214_p8 }
   0xe   : > { %218 = sbr.rel (%p215_p9) target bundleno = 453 (0x1c5), region = 40 }
  0x13   : > { %s3097_s30 = sshll.u32 %s3861_s22, 1  ;;  %v538_v0 = vlaneseq  ;;  %v3738_v1 = vld [vmem:[%s5530_s3 + $0x8] sm:$0xff]   ;;  %v3739_v2 = vld [vmem:[%s5530_s3] sm:$0xff]   ;;  %s3094_s10 = sshll.u32 %s3861_s22, 4  ;;  %v3806_v4 = vmov 1966171168  }
  0x14   : > { %p261_p10 = scmp.lt.s32.totalorder %s3097_s30, 3  ;;  %3560 = vmatprep.subr.bf16.mxu0 %v3738_v1  ;;  %3692 = vmatprep.subr.bf16.mxu1 %v3738_v1  ;;  %v536_v5 = vunpack.c.l.s4 %v3806_v4  ;;  %p254_p11 = scmp.lt.s32.totalorder %s3094_s10, 31  ;;  %vm1055_vm0 = vcmask 261120   ;;  %vm2611_vm1 = vcmask 523264   ;;  %vm2964_vm2 = vcmask 1041409  }
  0x15   : > { %v3895_v3 = vshrl.u32 %v538_v0, 7  ;;  %3561 = vmatpush3.bf16.msra.mxu0 %v3738_v1  ;;  %3694 = vmatpush3.bf16.msra.mxu1 %v3738_v1  ;;  %vm2966_vm3 = vcmask 1042434   ;;  %vm2968_vm4 = vcmask 1043459   ;;  %vm2970_vm5 = vcmask 1044484   ;;  %s3174_s13 = sshll.u32 %s3861_s22, 8  ;;  %s3807_s25 = smov [#allocation2]  }
  0x16   : > { %s5685_s30 = smov (!%p261_p10, %s3097_s30), 3  ;;  %3562 = vmatprep.subr.bf16.mxu0 %v3739_v2  ;;  %3693 = vmatprep.subr.bf16.mxu1 %v3739_v2  ;;  %v537_v7 = vunpack.c.0.s8 %v536_v5  ;;  %s5687_s10 = smov (!%p254_p11, %s3094_s10), 31  ;;  %vm2972_vm6 = vcmask 1045509   ;;  %vm2974_vm7 = vcmask 1046534   ;;  %vm2976_vm8 = vcmask 1047559  }
  0x17   : > { %v3899_v6 = vsub.s32 0, %v3895_v3  ;;  %s3098_s11 = sshll.u32 %s5685_s30, 3  ;;  %v1960_v8 = vsub.s32 1, %v3895_v3  ;;  %v1995_v9 = vsub.s32 2, %v3895_v3  ;;  %v2030_v10 = vsub.s32 3, %v3895_v3  ;;  %s3173_s23 = sshll.u32 %s5687_s10, 5 }
  0x18   : > { %s3906_s14 = scalar_lea.vmem %s5529_s2, %s3098_s11  ;;  %s264_s17 = scalar_lea.vmem %s5528_s1, %s3098_s11  ;;  %v3916_v13 = vsub.s32 %v537_v7, %v3895_v3  ;;  %v2065_v15 = vsub.s32 4, %v3895_v3  ;;  %v2100_v19 = vsub.s32 5, %v3895_v3  ;;  %v2135_v27 = vsub.s32 6, %v3895_v3 }
  0x19   : > { %v3913_v11 = vld [vmem:[%s3906_s14] sm:$0xff]  ;;  %3563 = vmatpush3.bf16.msra.mxu0 %v3739_v2  ;;  %3695 = vmatpush3.bf16.msra.mxu1 %v3739_v2  ;;  %v531_v14 = vld [vmem:[%s264_s17 + $0x8] sm:$0xff]  ;;  %s3945_s30 = scalar_lea.vmem %s5527_s0, %s3173_s23  ;;  %s250_s10 = sand.u32 1, %s3796_s19  }
  0x1a   : > { %v530_v12 = vld [vmem:[%s264_s17] sm:$0xff]  ;;  %v3921_v16 = vrot.slane %v3913_v11, %v3899_v6  ;;  %v583_v18 = vcombine.high %v531_v14, %v531_v14  ;;  %v3928_v21 = vrot.slane %v531_v14, %v3916_v13  ;;  %v3933_v22 = vrot.slane %v3913_v11, %v1960_v8  ;;  %v3431_v34 = vld [vmem:[%s3945_s30 + $0x8] sm:$0xff]   ;;  %v3432_v56 = vld [vmem:[%s3945_s30 + $0x10] sm:$0xff]   ;;  %s3093_s11 = sshll.u32 %s250_s10, 4  ;;  %s5478_s17 = scalar_lea.hbm %s5532_s5, %s3174_s13 }
  0x1b   : > { %v534_v17 = vcombine.high %v530_v12, %v530_v12  ;;  %v3925_v20 = vrot.slane %v530_v12, %v3916_v13  ;;  %v3938_v23 = vrot.slane %v3913_v11, %v1995_v9  ;;  %v3956_v26 = vrot.slane %v3913_v11, %v2030_v10  ;;  %v3176_v28 = vld [vmem:[%s3945_s30] sm:$0xff]   ;;  %v3463_v39 = vld [vmem:[%s3945_s30 + $0x108] sm:$0xff]   ;;  %v3464_v61 = vld [vmem:[%s3945_s30 + $0x110] sm:$0xff]   ;;  %s252_s12 = scalar_lea.vmem [#allocation2], %s3093_s11  ;;  %s5487_s22 = scalar_lea.sflag [#allocation3], %s250_s10 }
  0x1c   : > { %1936 = vbcast.lane.b32.xlu1 %v3921_v16, 272  ;;  %1928 = vbcast.lane.b32.xlu0 %v3921_v16, 256  ;;  %v3951_v25 = vrot.slane %v583_v18, %v3916_v13  ;;  %v3462_v31 = vld [vmem:[%s3945_s30 + $0x100] sm:$0xff]   ;;  %v598_v32 = vcombine.high %v3928_v21, %v3928_v21  ;;  %v3971_v33 = vrot.slane %v3928_v21, %v3916_v13  ;;  %v3177_v35 = vunpack.c.l.bf16 %v3176_v28  ;;  %v3433_v62 = vld [vmem:[%s3945_s30 + $0x18] sm:$0xff]   ;;  %s3748_s26 = sshll.u32 %s3807_s25, 4  ;;  %s3749_s26 = int_to_ptr.vmem [resolvable:$false] %s3748_s26 }
  0x1d   : > { %v3948_v24 = vrot.slane %v534_v17, %v3916_v13  ;;  %v549_v29 = vcombine.high %v3925_v20, %v3925_v20  ;;  %v3964_v30 = vrot.slane %v3925_v20, %v3916_v13  ;;  %v3178_v36 = vunpack.c.h.bf16 %v3176_v28  ;;  %v3465_v14 = vld [vmem:[%s3945_s30 + $0x118] sm:$0xff]  }
  0x1e   : > { %v3305_v37 = vunpack.c.l.bf16 %v3462_v31  ;;  %v3306_v38 = vunpack.c.h.bf16 %v3462_v31  ;;  %v628_v42 = vcombine.high %v3971_v33, %v3971_v33  ;;  %v667_v43 = vrot.slane %v3971_v33, %v3899_v6 }
  0x1f   : > { %v579_v40 = vcombine.high %v3964_v30, %v3964_v30  ;;  %v635_v41 = vrot.slane %v3964_v30, %v3899_v6  ;;  %v3181_v44 = vunpack.c.l.bf16 %v3431_v34  ;;  %v3182_v45 = vunpack.c.h.bf16 %v3431_v34 }
  0x20   : > { %1940 = vbcast.lane.b32.xlu1 %v3921_v16, 280  ;;  %1932 = vbcast.lane.b32.xlu0 %v3921_v16, 264  ;;  %v3309_v46 = vunpack.c.l.bf16 %v3463_v39  ;;  %v3310_v47 = vunpack.c.h.bf16 %v3463_v39  ;;  %v776_v50 = vsub.f32 %v3305_v37, %v667_v43  ;;  %v777_v51 = vsub.f32 %v3306_v38, %v667_v43 }
  0x21   : > { %v712_v48 = vsub.f32 %v3177_v35, %v635_v41  ;;  %v713_v49 = vsub.f32 %v3178_v36, %v635_v41  ;;  %v714_v52 = vsub.f32 %v3181_v44, %v635_v41  ;;  %v715_v53 = vsub.f32 %v3182_v45, %v635_v41 }
  0x22   : > { %v778_v54 = vsub.f32 %v3309_v46, %v667_v43  ;;  %v779_v55 = vsub.f32 %v3310_v47, %v667_v43  ;;  %v904_v59 = vmax.f32 %v776_v50, 0.0  ;;  %v905_v60 = vmax.f32 %v777_v51, 0.0  ;;  %v3434_v46 = vld [vmem:[%s3945_s30 + $0x20] sm:$0xff]  }
  0x23   : > { %v840_v57 = vmax.f32 %v712_v48, 0.0  ;;  %v841_v58 = vmax.f32 %v713_v49, 0.0  ;;  %v842_v63 = vmax.f32 %v714_v52, 0.0  ;;  %v843_v0 = vmax.f32 %v715_v53, 0.0 }
  0x24   : > { %1948 = vbcast.lane.b32.xlu1 %v3921_v16, 296  ;;  %1944 = vbcast.lane.b32.xlu0 %v3921_v16, 288  ;;  %v906_v1 = vmax.f32 %v778_v54, 0.0  ;;  %v907_v2 = vmax.f32 %v779_v55, 0.0  ;;  %v1000_v5 = vpack.c.bf16 %v905_v60, %v904_v59  ;;  %v3185_v7 = vunpack.c.l.bf16 %v3432_v56  ;;  %v3466_v55 = vld [vmem:[%s3945_s30 + $0x120] sm:$0xff]   ;;  %v3435_v60 = vld [vmem:[%s3945_s30 + $0x28] sm:$0xff]  }
  0x25   : > { %v968_v4 = vpack.c.bf16 %v841_v58, %v840_v57  ;;  %v3186_v12 = vunpack.c.h.bf16 %v3432_v56  ;;  %v969_v17 = vpack.c.bf16 %v843_v0, %v842_v63  ;;  %v3313_v28 = vunpack.c.l.bf16 %v3464_v61  ;;  %v3467_v0 = vld [vmem:[%s3945_s30 + $0x128] sm:$0xff]  }
  0x26   : > { %v1001_v18 = vpack.c.bf16 %v907_v2, %v906_v1  ;;  %v3314_v31 = vunpack.c.h.bf16 %v3464_v61  ;;  %3628 = vmatprep.mubr.msk.bf16.mxu1 %vm1055_vm0, %v1000_v5  ;;  %v716_v34 = vsub.f32 %v3185_v7, %v635_v41  ;;  %v3189_v36 = vunpack.c.l.bf16 %v3433_v62  ;;  %v3436_v1 = vld [vmem:[%s3945_s30 + $0x30] sm:$0xff]  }
  0x27   : > { %3564 = vmatprep.mubr.msk.bf16.mxu0 %vm1055_vm0, %v968_v4  ;;  %v717_v35 = vsub.f32 %v3186_v12, %v635_v41  ;;  %v3190_v37 = vunpack.c.h.bf16 %v3433_v62  ;;  %v780_v38 = vsub.f32 %v3313_v28, %v667_v43  ;;  %v3317_v44 = vunpack.c.l.bf16 %v3465_v14  ;;  %v3468_v5 = vld [vmem:[%s3945_s30 + $0x130] sm:$0xff]  }
  0x28   : > { %3565 = vmatmul.mubr.msk.bf16.vlgmr.msra.gmra.mxu0 %vm1055_vm0, %v969_v17  ;;  %3629 = vmatmul.mubr.msk.bf16.vlgmr.msra.gmra.mxu1 %vm1055_vm0, %v1001_v18  ;;  %v781_v39 = vsub.f32 %v3314_v31, %v667_v43  ;;  %v3318_v45 = vunpack.c.h.bf16 %v3465_v14  ;;  %v844_v47 = vmax.f32 %v716_v34, 0.0  ;;  %v718_v49 = vsub.f32 %v3189_v36, %v635_v41  ;;  %v3437_v18 = vld [vmem:[%s3945_s30 + $0x38] sm:$0xff]  }
  0x29   : > { %1956 = vbcast.lane.b32.xlu1 %v3921_v16, 312  ;;  %1952 = vbcast.lane.b32.xlu0 %v3921_v16, 304  ;;  %v845_v48 = vmax.f32 %v717_v35, 0.0  ;;  %v719_v50 = vsub.f32 %v3190_v37, %v635_v41  ;;  %v908_v51 = vmax.f32 %v780_v38, 0.0  ;;  %v782_v53 = vsub.f32 %v3317_v44, %v667_v43 }
  0x2a   : > { %v909_v52 = vmax.f32 %v781_v39, 0.0  ;;  %v783_v54 = vsub.f32 %v3318_v45, %v667_v43  ;;  %v846_v57 = vmax.f32 %v718_v49, 0.0  ;;  %v3193_v59 = vunpack.c.l.bf16 %v3434_v46 }
  0x2b   : > { %v970_v56 = vpack.c.bf16 %v845_v48, %v844_v47  ;;  %v847_v58 = vmax.f32 %v719_v50, 0.0  ;;  %v910_v62 = vmax.f32 %v782_v53, 0.0  ;;  %v3194_v63 = vunpack.c.h.bf16 %v3434_v46 }
  0x2c   : > { %v1002_v61 = vpack.c.bf16 %v909_v52, %v908_v51  ;;  %v911_v16 = vmax.f32 %v783_v54, 0.0  ;;  %v4008_v43 = vrot.slane %v549_v29, %v3916_v13  ;;  %v3321_v2 = vunpack.c.l.bf16 %v3466_v55 }
  0x2d   : > { %1967 = vbcast.lane.b32.xlu1 %v3933_v22, 264  ;;  %1963 = vbcast.lane.b32.xlu0 %v3933_v22, 256  ;;  %v971_v41 = vpack.c.bf16 %v847_v58, %v846_v57  ;;  %v3322_v4 = vunpack.c.h.bf16 %v3466_v55  ;;  %v4017_v12 = vrot.slane %v598_v32, %v3916_v13  ;;  %v3197_v14 = vunpack.c.l.bf16 %v3435_v60 }
  0x2e   : > { %3568 = vmatprep.mubr.msk.bf16.mxu0 %vm1055_vm0, %v970_v56  ;;  %3632 = vmatprep.mubr.msk.bf16.mxu1 %vm1055_vm0, %v1002_v61  ;;  %v1003_v7 = vpack.c.bf16 %v911_v16, %v910_v62  ;;  %v3198_v17 = vunpack.c.h.bf16 %v3435_v60  ;;  %v639_v20 = vrot.slane %v4008_v43, %v3899_v6  ;;  %v3325_v29 = vunpack.c.l.bf16 %v3467_v0  ;;  %v3469_v60 = vld [vmem:[%s3945_s30 + $0x138] sm:$0xff]  }
  0x2f   : > { %v3326_v28 = vunpack.c.h.bf16 %v3467_v0  ;;  %v3201_v31 = vunpack.c.l.bf16 %v3436_v1  ;;  %v671_v34 = vrot.slane %v4017_v12, %v3899_v6  ;;  %v3202_v35 = vunpack.c.h.bf16 %v3436_v1  ;;  %v3438_v0 = vld [vmem:[%s3945_s30 + $0x40] sm:$0xff]  }
  0x30   : > { %3569 = vmatmul.mubr.msk.bf16.gmra.mxu0 %vm1055_vm0, %v971_v41  ;;  %3633 = vmatmul.mubr.msk.bf16.gmra.mxu1 %vm1055_vm0, %v1003_v7  ;;  %v3329_v21 = vunpack.c.l.bf16 %v3468_v5  ;;  %v3330_v32 = vunpack.c.h.bf16 %v3468_v5  ;;  %v720_v36 = vsub.f32 %v3193_v59, %v639_v20  ;;  %v721_v37 = vsub.f32 %v3194_v63, %v639_v20 }
  0x31   : > { %1975 = vbcast.lane.b32.xlu1 %v3933_v22, 280  ;;  %1971 = vbcast.lane.b32.xlu0 %v3933_v22, 272  ;;  %v722_v38 = vsub.f32 %v3197_v14, %v639_v20  ;;  %v3205_v39 = vunpack.c.l.bf16 %v3437_v18  ;;  %v784_v44 = vsub.f32 %v3321_v2, %v671_v34  ;;  %v785_v45 = vsub.f32 %v3322_v4, %v671_v34 }
  0x32   : > { %v723_v46 = vsub.f32 %v3198_v17, %v639_v20  ;;  %v786_v47 = vsub.f32 %v3325_v29, %v671_v34  ;;  %v848_v48 = vmax.f32 %v720_v36, 0.0  ;;  %v849_v49 = vmax.f32 %v721_v37, 0.0  ;;  %v3470_v29 = vld [vmem:[%s3945_s30 + $0x140] sm:$0xff]  }
  0x33   : > { %v850_v50 = vmax.f32 %v722_v38, 0.0  ;;  %v787_v51 = vsub.f32 %v3326_v28, %v671_v34  ;;  %v912_v52 = vmax.f32 %v784_v44, 0.0  ;;  %v913_v53 = vmax.f32 %v785_v45, 0.0 }
  0x34   : > { %v851_v54 = vmax.f32 %v723_v46, 0.0  ;;  %v914_v55 = vmax.f32 %v786_v47, 0.0  ;;  %v972_v56 = vpack.c.bf16 %v849_v49, %v848_v48  ;;  %v724_v58 = vsub.f32 %v3201_v31, %v639_v20 }
  0x35   : > { %1983 = vbcast.lane.b32.xlu1 %v3933_v22, 296  ;;  %1979 = vbcast.lane.b32.xlu0 %v3933_v22, 288  ;;  %v915_v57 = vmax.f32 %v787_v51, 0.0  ;;  %v725_v59 = vsub.f32 %v3202_v35, %v639_v20  ;;  %v1004_v61 = vpack.c.bf16 %v913_v53, %v912_v52  ;;  %v788_v16 = vsub.f32 %v3329_v21, %v671_v34  ;;  %v3440_v53 = vld [vmem:[%s3945_s30 + $0x50] sm:$0xff]  }
  0x36   : > { %v973_v62 = vpack.c.bf16 %v851_v54, %v850_v50  ;;  %v789_v63 = vsub.f32 %v3330_v32, %v671_v34  ;;  %3572 = vmatprep.mubr.msk.bf16.mxu0 %vm1055_vm0, %v972_v56  ;;  %v852_v41 = vmax.f32 %v724_v58, 0.0  ;;  %v3206_v4 = vunpack.c.h.bf16 %v3437_v18  ;;  %v3439_v32 = vld [vmem:[%s3945_s30 + $0x48] sm:$0xff]   ;;  %v3472_v58 = vld [vmem:[%s3945_s30 + $0x150] sm:$0xff]  }
  0x37   : > { %v1005_v1 = vpack.c.bf16 %v915_v57, %v914_v55  ;;  %v853_v2 = vmax.f32 %v725_v59, 0.0  ;;  %3636 = vmatprep.mubr.msk.bf16.mxu1 %vm1055_vm0, %v1004_v61  ;;  %v916_v5 = vmax.f32 %v788_v16, 0.0  ;;  %v726_v14 = vsub.f32 %v3205_v39, %v639_v20 }
  0x38   : > { %3573 = vmatmul.mubr.msk.bf16.gmra.mxu0 %vm1055_vm0, %v973_v62  ;;  %v917_v7 = vmax.f32 %v789_v63, 0.0  ;;  %v3333_v17 = vunpack.c.l.bf16 %v3469_v60  ;;  %v727_v31 = vsub.f32 %v3206_v4, %v639_v20  ;;  %v3334_v35 = vunpack.c.h.bf16 %v3469_v60 }
  0x39   : > { %3637 = vmatmul.mubr.msk.bf16.gmra.mxu1 %vm1055_vm0, %v1005_v1  ;;  %1991 = vbcast.lane.b32.xlu1 %v3933_v22, 312  ;;  %v974_v28 = vpack.c.bf16 %v853_v2, %v852_v41  ;;  %v3209_v21 = vunpack.c.l.bf16 %v3438_v0  ;;  %v854_v36 = vmax.f32 %v726_v14, 0.0  ;;  %v3210_v38 = vunpack.c.h.bf16 %v3438_v0  ;;  %v3441_v41 = vld [vmem:[%s3945_s30 + $0x58] sm:$0xff]  }
  0x3a   : > { %1987 = vbcast.lane.b32.xlu0 %v3933_v22, 304  ;;  %v1006_v18 = vpack.c.bf16 %v917_v7, %v916_v5  ;;  %v790_v37 = vsub.f32 %v3333_v17, %v671_v34  ;;  %v855_v39 = vmax.f32 %v727_v31, 0.0  ;;  %v791_v44 = vsub.f32 %v3334_v35, %v671_v34  ;;  %v3471_v34 = vld [vmem:[%s3945_s30 + $0x148] sm:$0xff]   ;;  %v3473_v31 = vld [vmem:[%s3945_s30 + $0x158] sm:$0xff]  }
  0x3b   : > { %3576 = vmatprep.mubr.msk.bf16.mxu0 %vm1055_vm0, %v974_v28  ;;  %v4045_v45 = vrot.slane %v579_v40, %v3899_v6  ;;  %v3337_v20 = vunpack.c.l.bf16 %v3470_v29  ;;  %v3338_v22 = vunpack.c.h.bf16 %v3470_v29  ;;  %v4052_v47 = vrot.slane %v628_v42, %v3899_v6 }
  0x3c   : > { %3640 = vmatprep.mubr.msk.bf16.mxu1 %vm1055_vm0, %v1006_v18  ;;  %v918_v46 = vmax.f32 %v790_v37, 0.0  ;;  %v3213_v48 = vunpack.c.l.bf16 %v3439_v32  ;;  %v975_v30 = vpack.c.bf16 %v855_v39, %v854_v36  ;;  %v919_v40 = vmax.f32 %v791_v44, 0.0  ;;  %v3442_v44 = vld [vmem:[%s3945_s30 + $0x60] sm:$0xff]  }
  0x3d   : > { %2002 = vbcast.lane.b32.xlu1 %v3938_v23, 264  ;;  %v728_v49 = vsub.f32 %v3209_v21, %v4045_v45  ;;  %v729_v50 = vsub.f32 %v3210_v38, %v4045_v45  ;;  %v792_v51 = vsub.f32 %v3337_v20, %v4052_v47  ;;  %v793_v52 = vsub.f32 %v3338_v22, %v4052_v47 }
  0x3e   : > { %1998 = vbcast.lane.b32.xlu0 %v3938_v23, 256  ;;  %v3214_v33 = vunpack.c.h.bf16 %v3439_v32  ;;  %v730_v42 = vsub.f32 %v3213_v48, %v4045_v45  ;;  %v1007_v54 = vpack.c.bf16 %v919_v40, %v918_v46  ;;  %v3341_v57 = vunpack.c.l.bf16 %v3471_v34 }
  0x3f   : > { %v856_v55 = vmax.f32 %v728_v49, 0.0  ;;  %v857_v56 = vmax.f32 %v729_v50, 0.0  ;;  %v920_v59 = vmax.f32 %v792_v51, 0.0  ;;  %v921_v60 = vmax.f32 %v793_v52, 0.0  ;;  %v3474_v50 = vld [vmem:[%s3945_s30 + $0x160] sm:$0xff]  }
  0x40   : > { %3577 = vmatmul.mubr.msk.bf16.gmra.mxu0 %vm1055_vm0, %v975_v30  ;;  %v731_v61 = vsub.f32 %v3214_v33, %v4045_v45  ;;  %v858_v62 = vmax.f32 %v730_v42, 0.0  ;;  %v3342_v63 = vunpack.c.h.bf16 %v3471_v34  ;;  %v794_v0 = vsub.f32 %v3341_v57, %v4052_v47  ;;  %v3475_v57 = vld [vmem:[%s3945_s30 + $0x168] sm:$0xff]  }
  0x41   : > { %3641 = vmatmul.mubr.msk.bf16.gmra.mxu1 %vm1055_vm0, %v1007_v54  ;;  %2010 = vbcast.lane.b32.xlu1 %v3938_v23, 280  ;;  %v976_v16 = vpack.c.bf16 %v857_v56, %v856_v55  ;;  %v3217_v1 = vunpack.c.l.bf16 %v3440_v53  ;;  %v1008_v2 = vpack.c.bf16 %v921_v60, %v920_v59  ;;  %v3218_v5 = vunpack.c.h.bf16 %v3440_v53  ;;  %v3443_v53 = vld [vmem:[%s3945_s30 + $0x68] sm:$0xff]  }
  0x42   : > { %2006 = vbcast.lane.b32.xlu0 %v3938_v23, 272  ;;  %v859_v4 = vmax.f32 %v731_v61, 0.0  ;;  %v3345_v7 = vunpack.c.l.bf16 %v3472_v58  ;;  %v795_v14 = vsub.f32 %v3342_v63, %v4052_v47  ;;  %v922_v17 = vmax.f32 %v794_v0, 0.0 }
  0x43   : > { %3580 = vmatprep.mubr.msk.bf16.mxu0 %vm1055_vm0, %v976_v16  ;;  %v732_v29 = vsub.f32 %v3217_v1, %v4045_v45  ;;  %v3346_v28 = vunpack.c.h.bf16 %v3472_v58  ;;  %3644 = vmatprep.mubr.msk.bf16.mxu1 %vm1055_vm0, %v1008_v2  ;;  %v733_v21 = vsub.f32 %v3218_v5, %v4045_v45  ;;  %v3221_v18 = vunpack.c.l.bf16 %v3441_v41 }
  0x44   : > { %v977_v35 = vpack.c.bf16 %v859_v4, %v858_v62  ;;  %v796_v32 = vsub.f32 %v3345_v7, %v4052_v47  ;;  %v923_v36 = vmax.f32 %v795_v14, 0.0  ;;  %v3222_v39 = vunpack.c.h.bf16 %v3441_v41  ;;  %v3444_v62 = vld [vmem:[%s3945_s30 + $0x70] sm:$0xff]  }
  0x45   : > { %2018 = vbcast.lane.b32.xlu1 %v3938_v23, 296  ;;  %v860_v37 = vmax.f32 %v732_v29, 0.0  ;;  %v797_v38 = vsub.f32 %v3346_v28, %v4052_v47  ;;  %v861_v20 = vmax.f32 %v733_v21, 0.0  ;;  %v734_v22 = vsub.f32 %v3221_v18, %v4045_v45 }
  0x46   : > { %2014 = vbcast.lane.b32.xlu0 %v3938_v23, 288  ;;  %v924_v46 = vmax.f32 %v796_v32, 0.0  ;;  %v3349_v48 = vunpack.c.l.bf16 %v3473_v31  ;;  %v1009_v34 = vpack.c.bf16 %v923_v36, %v922_v17  ;;  %v735_v40 = vsub.f32 %v3222_v39, %v4045_v45 }
  0x47   : > { %v925_v30 = vmax.f32 %v797_v38, 0.0  ;;  %v3350_v49 = vunpack.c.h.bf16 %v3473_v31  ;;  %v978_v51 = vpack.c.bf16 %v861_v20, %v860_v37  ;;  %v862_v52 = vmax.f32 %v734_v22, 0.0  ;;  %v3476_v38 = vld [vmem:[%s3945_s30 + $0x170] sm:$0xff]   ;;  %v3445_v22 = vld [vmem:[%s3945_s30 + $0x78] sm:$0xff]  }
  0x48   : > { %3581 = vmatmul.mubr.msk.bf16.gmra.mxu0 %vm1055_vm0, %v977_v35  ;;  %v798_v33 = vsub.f32 %v3349_v48, %v4052_v47  ;;  %v3225_v42 = vunpack.c.l.bf16 %v3442_v44  ;;  %v863_v55 = vmax.f32 %v735_v40, 0.0  ;;  %v3226_v45 = vunpack.c.h.bf16 %v3442_v44 }
  0x49   : > { %3645 = vmatmul.mubr.msk.bf16.gmra.mxu1 %vm1055_vm0, %v1009_v34  ;;  %2026 = vbcast.lane.b32.xlu1 %v3938_v23, 312  ;;  %v1010_v54 = vpack.c.bf16 %v925_v30, %v924_v46  ;;  %v799_v56 = vsub.f32 %v3350_v49, %v4052_v47  ;;  %v581_v59 = vcombine.high %v4008_v43, %v4008_v43  ;;  %v3353_v60 = vunpack.c.l.bf16 %v3474_v50  ;;  %v3477_v49 = vld [vmem:[%s3945_s30 + $0x178] sm:$0xff]  }
  0x4a   : > { %2022 = vbcast.lane.b32.xlu0 %v3938_v23, 304  ;;  %3584 = vmatprep.mubr.msk.bf16.mxu0 %vm1055_vm0, %v978_v51  ;;  %v926_v58 = vmax.f32 %v798_v33, 0.0  ;;  %v3354_v61 = vunpack.c.h.bf16 %v3474_v50  ;;  %v979_v16 = vpack.c.bf16 %v863_v55, %v862_v52  ;;  %v630_v47 = vcombine.high %v4017_v12, %v4017_v12 }
  0x4b   : > { %3648 = vmatprep.mubr.msk.bf16.mxu1 %vm1055_vm0, %v1010_v54  ;;  %v927_v63 = vmax.f32 %v799_v56, 0.0  ;;  %v3229_v0 = vunpack.c.l.bf16 %v3443_v53  ;;  %v647_v1 = vrot.slane %v581_v59, %v3899_v6  ;;  %v3230_v23 = vunpack.c.h.bf16 %v3443_v53 }
  0x4c   : > { %v3357_v41 = vunpack.c.l.bf16 %v3475_v57  ;;  %v3358_v2 = vunpack.c.h.bf16 %v3475_v57  ;;  %v679_v43 = vrot.slane %v630_v47, %v3899_v6  ;;  %v3233_v5 = vunpack.c.l.bf16 %v3444_v62 }
  0x4d   : > { %2037 = vbcast.lane.b32.xlu1 %v3956_v26, 264  ;;  %v1011_v4 = vpack.c.bf16 %v927_v63, %v926_v58  ;;  %v3234_v7 = vunpack.c.h.bf16 %v3444_v62  ;;  %v736_v14 = vsub.f32 %v3225_v42, %v647_v1  ;;  %v737_v17 = vsub.f32 %v3226_v45, %v647_v1  ;;  %v3446_v42 = vld [vmem:[%s3945_s30 + $0x80] sm:$0xff]  }
  0x4e   : > { %2033 = vbcast.lane.b32.xlu0 %v3956_v26, 256  ;;  %v738_v29 = vsub.f32 %v3229_v0, %v647_v1  ;;  %v739_v12 = vsub.f32 %v3230_v23, %v647_v1  ;;  %v800_v28 = vsub.f32 %v3353_v60, %v679_v43  ;;  %v801_v31 = vsub.f32 %v3354_v61, %v679_v43 }
  0x4f   : > { %v802_v35 = vsub.f32 %v3357_v41, %v679_v43  ;;  %v803_v21 = vsub.f32 %v3358_v2, %v679_v43  ;;  %v864_v32 = vmax.f32 %v736_v14, 0.0  ;;  %v865_v18 = vmax.f32 %v737_v17, 0.0  ;;  %v3478_v41 = vld [vmem:[%s3945_s30 + $0x180] sm:$0xff]   ;;  %v3447_v14 = vld [vmem:[%s3945_s30 + $0x88] sm:$0xff]  }
  0x50   : > { %3585 = vmatmul.mubr.msk.bf16.gmra.mxu0 %vm1055_vm0, %v979_v16  ;;  %v866_v36 = vmax.f32 %v738_v29, 0.0  ;;  %v867_v37 = vmax.f32 %v739_v12, 0.0  ;;  %v928_v39 = vmax.f32 %v800_v28, 0.0  ;;  %v929_v44 = vmax.f32 %v801_v31, 0.0  ;;  %v3479_v17 = vld [vmem:[%s3945_s30 + $0x188] sm:$0xff]  }
  0x51   : > { %3649 = vmatmul.mubr.msk.bf16.gmra.mxu1 %vm1055_vm0, %v1011_v4  ;;  %2045 = vbcast.lane.b32.xlu1 %v3956_v26, 280  ;;  %v930_v20 = vmax.f32 %v802_v35, 0.0  ;;  %v931_v46 = vmax.f32 %v803_v21, 0.0  ;;  %v980_v48 = vpack.c.bf16 %v865_v18, %v864_v32  ;;  %v740_v30 = vsub.f32 %v3233_v5, %v647_v1  ;;  %v3448_v32 = vld [vmem:[%s3945_s30 + $0x90] sm:$0xff]  }
  0x52   : > { %2041 = vbcast.lane.b32.xlu0 %v3956_v26, 272  ;;  %v981_v34 = vpack.c.bf16 %v867_v37, %v866_v36  ;;  %v741_v40 = vsub.f32 %v3234_v7, %v647_v1  ;;  %v1012_v50 = vpack.c.bf16 %v929_v44, %v928_v39  ;;  %v3361_v52 = vunpack.c.l.bf16 %v3476_v38 }
  0x53   : > { %v1013_v51 = vpack.c.bf16 %v931_v46, %v930_v20  ;;  %v3362_v33 = vunpack.c.h.bf16 %v3476_v38  ;;  %3588 = vmatprep.mubr.msk.bf16.mxu0 %vm1055_vm0, %v980_v48  ;;  %v868_v53 = vmax.f32 %v740_v30, 0.0  ;;  %v3237_v55 = vunpack.c.l.bf16 %v3445_v22 }
  0x54   : > { %v869_v54 = vmax.f32 %v741_v40, 0.0  ;;  %v3238_v56 = vunpack.c.h.bf16 %v3445_v22  ;;  %3652 = vmatprep.mubr.msk.bf16.mxu1 %vm1055_vm0, %v1012_v50  ;;  %v804_v45 = vsub.f32 %v3361_v52, %v679_v43  ;;  %v3365_v58 = vunpack.c.l.bf16 %v3477_v49 }
  0x55   : > { %2053 = vbcast.lane.b32.xlu1 %v3956_v26, 296  ;;  %v805_v57 = vsub.f32 %v3362_v33, %v679_v43  ;;  %v3366_v59 = vunpack.c.h.bf16 %v3477_v49  ;;  %v742_v61 = vsub.f32 %v3237_v55, %v647_v1  ;;  %v3241_v16 = vunpack.c.l.bf16 %v3446_v42 }
  0x56   : > { %2049 = vbcast.lane.b32.xlu0 %v3956_v26, 288  ;;  %v982_v60 = vpack.c.bf16 %v869_v54, %v868_v53  ;;  %v743_v62 = vsub.f32 %v3238_v56, %v647_v1  ;;  %v932_v63 = vmax.f32 %v804_v45, 0.0  ;;  %v806_v0 = vsub.f32 %v3365_v58, %v679_v43  ;;  %v3480_v53 = vld [vmem:[%s3945_s30 + $0x190] sm:$0xff]  }
  0x57   : > { %v933_v47 = vmax.f32 %v805_v57, 0.0  ;;  %v807_v23 = vsub.f32 %v3366_v59, %v679_v43  ;;  %v870_v2 = vmax.f32 %v742_v61, 0.0  ;;  %v3242_v5 = vunpack.c.h.bf16 %v3446_v42  ;;  %v3449_v57 = vld [vmem:[%s3945_s30 + $0x98] sm:$0xff]  }
  0x58   : > { %3589 = vmatmul.mubr.msk.bf16.gmra.mxu0 %vm1055_vm0, %v981_v34  ;;  %v871_v4 = vmax.f32 %v743_v62, 0.0  ;;  %v4120_v7 = vrot.slane %v3948_v24, %v3916_v13  ;;  %v4129_v1 = vrot.slane %v3913_v11, %v2065_v15  ;;  %v934_v29 = vmax.f32 %v806_v0, 0.0  ;;  %v3481_v62 = vld [vmem:[%s3945_s30 + $0x198] sm:$0xff]  }
  0x59   : > { %3653 = vmatmul.mubr.msk.bf16.gmra.mxu1 %vm1055_vm0, %v1013_v51  ;;  %2061 = vbcast.lane.b32.xlu1 %v3956_v26, 312  ;;  %v1014_v43 = vpack.c.bf16 %v933_v47, %v932_v63  ;;  %v935_v12 = vmax.f32 %v807_v23, 0.0  ;;  %v3369_v31 = vunpack.c.l.bf16 %v3478_v41  ;;  %v3370_v35 = vunpack.c.h.bf16 %v3478_v41 }
  0x5a   : > { %2057 = vbcast.lane.b32.xlu0 %v3956_v26, 304  ;;  %3592 = vmatprep.mubr.msk.bf16.mxu0 %vm1055_vm0, %v982_v60  ;;  %v651_v28 = vrot.slane %v4120_v7, %v3899_v6  ;;  %v4137_v21 = vrot.slane %v3951_v25, %v3916_v13  ;;  %v983_v18 = vpack.c.bf16 %v871_v4, %v870_v2  ;;  %v3245_v36 = vunpack.c.l.bf16 %v3447_v14 }
  0x5b   : > { %3656 = vmatprep.mubr.msk.bf16.mxu1 %vm1055_vm0, %v1014_v43  ;;  %v3246_v37 = vunpack.c.h.bf16 %v3447_v14  ;;  %v3373_v38 = vunpack.c.l.bf16 %v3479_v17  ;;  %v3374_v20 = vunpack.c.h.bf16 %v3479_v17  ;;  %v1015_v46 = vpack.c.bf16 %v935_v12, %v934_v29  ;;  %v3450_v43 = vld [vmem:[%s3945_s30 + $0xa0] sm:$0xff]  }
  0x5c   : > { %v744_v39 = vsub.f32 %v3241_v16, %v651_v28  ;;  %v745_v26 = vsub.f32 %v3242_v5, %v651_v28  ;;  %v683_v44 = vrot.slane %v4137_v21, %v3899_v6  ;;  %v746_v22 = vsub.f32 %v3245_v36, %v651_v28 }
  0x5d   : > { %2072 = vbcast.lane.b32.xlu1 %v4129_v1, 264  ;;  %v747_v48 = vsub.f32 %v3246_v37, %v651_v28  ;;  %v3249_v34 = vunpack.c.l.bf16 %v3448_v32  ;;  %v3250_v45 = vunpack.c.h.bf16 %v3448_v32  ;;  %v4153_v60 = vrot.slane %v3913_v11, %v2100_v19 }
  0x5e   : > { %2068 = vbcast.lane.b32.xlu0 %v4129_v1, 256  ;;  %v872_v30 = vmax.f32 %v744_v39, 0.0  ;;  %v873_v40 = vmax.f32 %v745_v26, 0.0  ;;  %v808_v49 = vsub.f32 %v3369_v31, %v683_v44  ;;  %v809_v50 = vsub.f32 %v3370_v35, %v683_v44 }
  0x5f   : > { %v874_v51 = vmax.f32 %v746_v22, 0.0  ;;  %v875_v52 = vmax.f32 %v747_v48, 0.0  ;;  %v810_v33 = vsub.f32 %v3373_v38, %v683_v44  ;;  %v811_v42 = vsub.f32 %v3374_v20, %v683_v44  ;;  %v3482_v38 = vld [vmem:[%s3945_s30 + $0x1a0] sm:$0xff]   ;;  %v3451_v22 = vld [vmem:[%s3945_s30 + $0xa8] sm:$0xff]  }
  0x60   : > { %3593 = vmatmul.mubr.msk.bf16.gmra.mxu0 %vm1055_vm0, %v983_v18  ;;  %v984_v54 = vpack.c.bf16 %v873_v40, %v872_v30  ;;  %v936_v55 = vmax.f32 %v808_v49, 0.0  ;;  %v937_v56 = vmax.f32 %v809_v50, 0.0  ;;  %v748_v61 = vsub.f32 %v3249_v34, %v651_v28  ;;  %v3483_v40 = vld [vmem:[%s3945_s30 + $0x1a8] sm:$0xff]  }
  0x61   : > { %3657 = vmatmul.mubr.msk.bf16.gmra.mxu1 %vm1055_vm0, %v1015_v46  ;;  %2080 = vbcast.lane.b32.xlu1 %v4129_v1, 280  ;;  %v938_v58 = vmax.f32 %v810_v33, 0.0  ;;  %v939_v59 = vmax.f32 %v811_v42, 0.0  ;;  %v749_v63 = vsub.f32 %v3250_v45, %v651_v28  ;;  %v3377_v47 = vunpack.c.l.bf16 %v3480_v53  ;;  %v3484_v33 = vld [vmem:[%s3945_s30 + $0x1b0] sm:$0xff]  }
  0x62   : > { %2076 = vbcast.lane.b32.xlu0 %v4129_v1, 272  ;;  %3596 = vmatprep.mubr.msk.bf16.mxu0 %vm1055_vm0, %v984_v54  ;;  %v1016_v16 = vpack.c.bf16 %v937_v56, %v936_v55  ;;  %v3378_v0 = vunpack.c.h.bf16 %v3480_v53  ;;  %v985_v23 = vpack.c.bf16 %v875_v52, %v874_v51  ;;  %v876_v41 = vmax.f32 %v748_v61, 0.0  ;;  %v3452_v52 = vld [vmem:[%s3945_s30 + $0xb0] sm:$0xff]   ;;  %v3453_v55 = vld [vmem:[%s3945_s30 + $0xb8] sm:$0xff]  }
  0x63   : > { %v3253_v2 = vunpack.c.l.bf16 %v3449_v57  ;;  %v3254_v4 = vunpack.c.h.bf16 %v3449_v57  ;;  %v877_v11 = vmax.f32 %v749_v63, 0.0  ;;  %v812_v5 = vsub.f32 %v3377_v47, %v683_v44 }
  0x64   : > { %3660 = vmatprep.mubr.msk.bf16.mxu1 %vm1055_vm0, %v1016_v16  ;;  %v813_v14 = vsub.f32 %v3378_v0, %v683_v44  ;;  %v3381_v17 = vunpack.c.l.bf16 %v3481_v62  ;;  %v1017_v29 = vpack.c.bf16 %v939_v59, %v938_v58  ;;  %v3382_v35 = vunpack.c.h.bf16 %v3481_v62 }
  0x65   : > { %2088 = vbcast.lane.b32.xlu1 %v4129_v1, 296  ;;  %v750_v12 = vsub.f32 %v3253_v2, %v651_v28  ;;  %v751_v31 = vsub.f32 %v3254_v4, %v651_v28  ;;  %v986_v32 = vpack.c.bf16 %v877_v11, %v876_v41  ;;  %v940_v18 = vmax.f32 %v812_v5, 0.0 }
  0x66   : > { %2084 = vbcast.lane.b32.xlu0 %v4129_v1, 288  ;;  %v941_v36 = vmax.f32 %v813_v14, 0.0  ;;  %v814_v37 = vsub.f32 %v3381_v17, %v683_v44  ;;  %v815_v20 = vsub.f32 %v3382_v35, %v683_v44  ;;  %v3257_v46 = vunpack.c.l.bf16 %v3450_v43 }
  0x67   : > { %v878_v39 = vmax.f32 %v750_v12, 0.0  ;;  %v879_v26 = vmax.f32 %v751_v31, 0.0  ;;  %v3258_v34 = vunpack.c.h.bf16 %v3450_v43  ;;  %v550_v30 = vcombine.high %v3948_v24, %v3948_v24 }
  0x68   : > { %3597 = vmatmul.mubr.msk.bf16.gmra.mxu0 %vm1055_vm0, %v985_v23  ;;  %v1018_v48 = vpack.c.bf16 %v941_v36, %v940_v18  ;;  %v942_v28 = vmax.f32 %v814_v37, 0.0  ;;  %v943_v50 = vmax.f32 %v815_v20, 0.0  ;;  %v3385_v44 = vunpack.c.l.bf16 %v3482_v38 }
  0x69   : > { %3661 = vmatmul.mubr.msk.bf16.gmra.mxu1 %vm1055_vm0, %v1017_v29  ;;  %2096 = vbcast.lane.b32.xlu1 %v4129_v1, 312  ;;  %v987_v49 = vpack.c.bf16 %v879_v26, %v878_v39  ;;  %v599_v51 = vcombine.high %v3951_v25, %v3951_v25  ;;  %v4177_v24 = vrot.slane %v550_v30, %v3916_v13  ;;  %v3386_v42 = vunpack.c.h.bf16 %v3482_v38  ;;  %v3485_v39 = vld [vmem:[%s3945_s30 + $0x1b8] sm:$0xff]  }
  0x6a   : > { %2092 = vbcast.lane.b32.xlu0 %v4129_v1, 304  ;;  %3600 = vmatprep.mubr.msk.bf16.mxu0 %vm1055_vm0, %v986_v32  ;;  %v3261_v53 = vunpack.c.l.bf16 %v3451_v22  ;;  %v3262_v54 = vunpack.c.h.bf16 %v3451_v22  ;;  %v1019_v56 = vpack.c.bf16 %v943_v50, %v942_v28  ;;  %v3389_v25 = vunpack.c.l.bf16 %v3483_v40 }
  0x6b   : > { %3664 = vmatprep.mubr.msk.bf16.mxu1 %vm1055_vm0, %v1018_v48  ;;  %v4182_v45 = vrot.slane %v599_v51, %v3916_v13  ;;  %v3390_v57 = vunpack.c.h.bf16 %v3483_v40  ;;  %v655_v1 = vrot.slane %v4177_v24, %v3899_v6  ;;  %v3265_v58 = vunpack.c.l.bf16 %v3452_v52  ;;  %v3454_v40 = vld [vmem:[%s3945_s30 + $0xc0] sm:$0xff]  }
  0x6c   : > { %v3266_v59 = vunpack.c.h.bf16 %v3452_v52  ;;  %v3393_v61 = vunpack.c.l.bf16 %v3484_v33  ;;  %v3394_v16 = vunpack.c.h.bf16 %v3484_v33  ;;  %v3269_v63 = vunpack.c.l.bf16 %v3453_v55  ;;  %v3486_v52 = vld [vmem:[%s3945_s30 + $0x1c0] sm:$0xff]  }
  0x6d   : > { %2107 = vbcast.lane.b32.xlu1 %v4153_v60, 264  ;;  %v687_v62 = vrot.slane %v4182_v45, %v3899_v6  ;;  %v3270_v47 = vunpack.c.h.bf16 %v3453_v55  ;;  %v752_v13 = vsub.f32 %v3257_v46, %v655_v1  ;;  %v753_v0 = vsub.f32 %v3258_v34, %v655_v1  ;;  %v4202_v33 = vld [vmem:[%s3906_s14] sm:$0xff] }
  0x6e   : > { %2103 = vbcast.lane.b32.xlu0 %v4153_v60, 256  ;;  %v754_v23 = vsub.f32 %v3261_v53, %v655_v1  ;;  %v755_v41 = vsub.f32 %v3262_v54, %v655_v1  ;;  %v756_v37 = vsub.f32 %v3265_v58, %v655_v1  ;;  %v757_v38 = vsub.f32 %v3266_v59, %v655_v1  ;;  %v3487_v59 = vld [vmem:[%s3945_s30 + $0x1c8] sm:$0xff]  }
  0x6f   : > { %v816_v2 = vsub.f32 %v3385_v44, %v687_v62  ;;  %v817_v4 = vsub.f32 %v3386_v42, %v687_v62  ;;  %v818_v11 = vsub.f32 %v3389_v25, %v687_v62  ;;  %v819_v5 = vsub.f32 %v3390_v57, %v687_v62 }
  0x70   : > { %3601 = vmatmul.mubr.msk.bf16.gmra.mxu0 %vm1055_vm0, %v987_v49  ;;  %v880_v14 = vmax.f32 %v752_v13, 0.0  ;;  %v881_v17 = vmax.f32 %v753_v0, 0.0  ;;  %v882_v43 = vmax.f32 %v754_v23, 0.0  ;;  %v883_v29 = vmax.f32 %v755_v41, 0.0  ;;  %v3456_v13 = vld [vmem:[%s3945_s30 + $0xd0] sm:$0xff]  }
  0x71   : > { %3665 = vmatmul.mubr.msk.bf16.gmra.mxu1 %vm1055_vm0, %v1019_v56  ;;  %2115 = vbcast.lane.b32.xlu1 %v4153_v60, 280  ;;  %v944_v12 = vmax.f32 %v816_v2, 0.0  ;;  %v945_v31 = vmax.f32 %v817_v4, 0.0  ;;  %v946_v35 = vmax.f32 %v818_v11, 0.0  ;;  %v947_v32 = vmax.f32 %v819_v5, 0.0  ;;  %v3455_v56 = vld [vmem:[%s3945_s30 + $0xc8] sm:$0xff]  }
  0x72   : > { %2111 = vbcast.lane.b32.xlu0 %v4153_v60, 272  ;;  %v988_v18 = vpack.c.bf16 %v881_v17, %v880_v14  ;;  %v989_v36 = vpack.c.bf16 %v883_v29, %v882_v43  ;;  %v820_v46 = vsub.f32 %v3393_v61, %v687_v62  ;;  %v821_v22 = vsub.f32 %v3394_v16, %v687_v62 }
  0x73   : > { %v1020_v26 = vpack.c.bf16 %v945_v31, %v944_v12  ;;  %v1021_v20 = vpack.c.bf16 %v947_v32, %v946_v35  ;;  %v884_v48 = vmax.f32 %v756_v37, 0.0  ;;  %v885_v28 = vmax.f32 %v757_v38, 0.0 }
  0x74   : > { %3604 = vmatprep.mubr.msk.bf16.mxu0 %vm1055_vm0, %v988_v18  ;;  %v758_v34 = vsub.f32 %v3269_v63, %v655_v1  ;;  %v759_v30 = vsub.f32 %v3270_v47, %v655_v1  ;;  %v948_v49 = vmax.f32 %v820_v46, 0.0  ;;  %v949_v50 = vmax.f32 %v821_v22, 0.0 }
  0x75   : > { %2123 = vbcast.lane.b32.xlu1 %v4153_v60, 296  ;;  %3668 = vmatprep.mubr.msk.bf16.mxu1 %vm1055_vm0, %v1020_v26  ;;  %v3397_v44 = vunpack.c.l.bf16 %v3485_v39  ;;  %v3398_v51 = vunpack.c.h.bf16 %v3485_v39  ;;  %v4207_v42 = vrot.slane %v4202_v33, %v2135_v27  ;;  %v990_v53 = vpack.c.bf16 %v885_v28, %v884_v48  ;;  %v3488_v26 = vld [vmem:[%s3945_s30 + $0x1d0] sm:$0xff]   ;;  %v3457_v28 = vld [vmem:[%s3945_s30 + $0xd8] sm:$0xff]  }
  0x76   : > { %2119 = vbcast.lane.b32.xlu0 %v4153_v60, 288  ;;  %v886_v54 = vmax.f32 %v758_v34, 0.0  ;;  %v887_v55 = vmax.f32 %v759_v30, 0.0  ;;  %v1022_v25 = vpack.c.bf16 %v949_v50, %v948_v49  ;;  %v3273_v58 = vunpack.c.l.bf16 %v3454_v40  ;;  %v3489_v50 = vld [vmem:[%s3945_s30 + $0x1d8] sm:$0xff]  }
  0x77   : > { %v822_v57 = vsub.f32 %v3397_v44, %v687_v62  ;;  %v823_v1 = vsub.f32 %v3398_v51, %v687_v62  ;;  %v3274_v61 = vunpack.c.h.bf16 %v3454_v40  ;;  %v580_v16 = vcombine.high %v4120_v7, %v4120_v7 }
  0x78   : > { %3605 = vmatmul.mubr.msk.bf16.gmra.mxu0 %vm1055_vm0, %v989_v36  ;;  %v3401_v63 = vunpack.c.l.bf16 %v3486_v52  ;;  %v3402_v47 = vunpack.c.h.bf16 %v3486_v52  ;;  %v629_v62 = vcombine.high %v4137_v21, %v4137_v21  ;;  %v3277_v41 = vunpack.c.l.bf16 %v3455_v56 }
  0x79   : > { %3669 = vmatmul.mubr.msk.bf16.gmra.mxu1 %vm1055_vm0, %v1021_v20  ;;  %2131 = vbcast.lane.b32.xlu1 %v4153_v60, 312  ;;  %v950_v0 = vmax.f32 %v822_v57, 0.0  ;;  %v951_v23 = vmax.f32 %v823_v1, 0.0  ;;  %v659_v2 = vrot.slane %v580_v16, %v3899_v6  ;;  %v3278_v7 = vunpack.c.h.bf16 %v3455_v56 }
  0x7a   : > { %2127 = vbcast.lane.b32.xlu0 %v4153_v60, 304  ;;  %3608 = vmatprep.mubr.msk.bf16.mxu0 %vm1055_vm0, %v990_v53  ;;  %v3405_v4 = vunpack.c.l.bf16 %v3487_v59  ;;  %v3406_v11 = vunpack.c.h.bf16 %v3487_v59  ;;  %v991_v5 = vpack.c.bf16 %v887_v55, %v886_v54  ;;  %v691_v17 = vrot.slane %v629_v62, %v3899_v6 }
  0x7b   : > { %3672 = vmatprep.mubr.msk.bf16.mxu1 %vm1055_vm0, %v1022_v25  ;;  %v1023_v14 = vpack.c.bf16 %v951_v23, %v950_v0  ;;  %v3281_v43 = vunpack.c.l.bf16 %v3456_v13  ;;  %v760_v29 = vsub.f32 %v3273_v58, %v659_v2  ;;  %v761_v21 = vsub.f32 %v3274_v61, %v659_v2 }
  0x7c   : > { %v762_v12 = vsub.f32 %v3277_v41, %v659_v2  ;;  %v763_v31 = vsub.f32 %v3278_v7, %v659_v2  ;;  %v824_v60 = vsub.f32 %v3401_v63, %v691_v17  ;;  %v825_v35 = vsub.f32 %v3402_v47, %v691_v17  ;;  %v3490_v7 = vld [vmem:[%s3945_s30 + $0x1e0] sm:$0xff]  }
  0x7d   : > { %2142 = vbcast.lane.b32.xlu1 %v4207_v42, 264  ;;  %v826_v32 = vsub.f32 %v3405_v4, %v691_v17  ;;  %v827_v18 = vsub.f32 %v3406_v11, %v691_v17  ;;  %v888_v36 = vmax.f32 %v760_v29, 0.0  ;;  %v889_v37 = vmax.f32 %v761_v21, 0.0 }
  0x7e   : > { %2138 = vbcast.lane.b32.xlu0 %v4207_v42, 256  ;;  %v890_v38 = vmax.f32 %v762_v12, 0.0  ;;  %v891_v39 = vmax.f32 %v763_v31, 0.0  ;;  %v952_v20 = vmax.f32 %v824_v60, 0.0  ;;  %v953_v46 = vmax.f32 %v825_v35, 0.0  ;;  %v3491_v31 = vld [vmem:[%s3945_s30 + $0x1e8] sm:$0xff]  }
  0x7f   : > { %v954_v22 = vmax.f32 %v826_v32, 0.0  ;;  %v2170_v48 = vsub.s32 7, %v3895_v3  ;;  %v992_v34 = vpack.c.bf16 %v889_v37, %v888_v36  ;;  %v955_v30 = vmax.f32 %v827_v18, 0.0 }
  0x80   : > { %3609 = vmatmul.mubr.msk.bf16.gmra.mxu0 %vm1055_vm0, %v991_v5  ;;  %v3282_v40 = vunpack.c.h.bf16 %v3456_v13  ;;  %v764_v49 = vsub.f32 %v3281_v43, %v659_v2  ;;  %v1024_v44 = vpack.c.bf16 %v953_v46, %v952_v20  ;;  %v993_v51 = vpack.c.bf16 %v891_v39, %v890_v38  ;;  %v3458_v13 = vld [vmem:[%s3945_s30 + $0xe0] sm:$0xff]  }
  0x81   : > { %3673 = vmatmul.mubr.msk.bf16.gmra.mxu1 %vm1055_vm0, %v1023_v14  ;;  %2150 = vbcast.lane.b32.xlu1 %v4207_v42, 280  ;;  %v3409_v52 = vunpack.c.l.bf16 %v3488_v26  ;;  %v3410_v53 = vunpack.c.h.bf16 %v3488_v26  ;;  %v3285_v56 = vunpack.c.l.bf16 %v3457_v28  ;;  %v3286_v25 = vunpack.c.h.bf16 %v3457_v28 }
  0x82   : > { %2146 = vbcast.lane.b32.xlu0 %v4207_v42, 272  ;;  %3612 = vmatprep.mubr.msk.bf16.mxu0 %vm1055_vm0, %v992_v34  ;;  %v765_v54 = vsub.f32 %v3282_v40, %v659_v2  ;;  %v892_v55 = vmax.f32 %v764_v49, 0.0  ;;  %v3413_v58 = vunpack.c.l.bf16 %v3489_v50  ;;  %v3414_v59 = vunpack.c.h.bf16 %v3489_v50  ;;  %v3460_v40 = vld [vmem:[%s3945_s30 + $0xf0] sm:$0xff]  }
  0x83   : > { %3676 = vmatprep.mubr.msk.bf16.mxu1 %vm1055_vm0, %v1024_v44  ;;  %v828_v57 = vsub.f32 %v3409_v52, %v691_v17  ;;  %v829_v1 = vsub.f32 %v3410_v53, %v691_v17  ;;  %v1025_v61 = vpack.c.bf16 %v955_v30, %v954_v22  ;;  %v766_v63 = vsub.f32 %v3285_v56, %v659_v2 }
  0x84   : > { %v893_v16 = vmax.f32 %v765_v54, 0.0  ;;  %v767_v47 = vsub.f32 %v3286_v25, %v659_v2  ;;  %v830_v62 = vsub.f32 %v3413_v58, %v691_v17  ;;  %v831_v41 = vsub.f32 %v3414_v59, %v691_v17  ;;  %v3459_v2 = vld [vmem:[%s3945_s30 + $0xe8] sm:$0xff]  }
  0x85   : > { %2158 = vbcast.lane.b32.xlu1 %v4207_v42, 296  ;;  %v956_v0 = vmax.f32 %v828_v57, 0.0  ;;  %v957_v23 = vmax.f32 %v829_v1, 0.0  ;;  %v4243_v4 = vrot.slane %v4202_v33, %v2170_v48  ;;  %v894_v5 = vmax.f32 %v766_v63, 0.0  ;;  %v3492_v57 = vld [vmem:[%s3945_s30 + $0x1f0] sm:$0xff]  }
  0x86   : > { %2154 = vbcast.lane.b32.xlu0 %v4207_v42, 288  ;;  %v994_v11 = vpack.c.bf16 %v893_v16, %v892_v55  ;;  %v895_v14 = vmax.f32 %v767_v47, 0.0  ;;  %v3289_v29 = vunpack.c.l.bf16 %v3458_v13  ;;  %v3290_v21 = vunpack.c.h.bf16 %v3458_v13  ;;  %v3493_v16 = vld [vmem:[%s3945_s30 + $0x1f8] sm:$0xff]  }
  0x87   : > { %v1026_v43 = vpack.c.bf16 %v957_v23, %v956_v0  ;;  %v582_v12 = vcombine.high %v4177_v24, %v4177_v24  ;;  %v958_v17 = vmax.f32 %v830_v62, 0.0  ;;  %v3417_v60 = vunpack.c.l.bf16 %v3490_v7 }
  0x88   : > { %3613 = vmatmul.mubr.msk.bf16.gmra.mxu0 %vm1055_vm0, %v993_v51  ;;  %v3418_v35 = vunpack.c.h.bf16 %v3490_v7  ;;  %v631_v33 = vcombine.high %v4182_v45, %v4182_v45  ;;  %v959_v32 = vmax.f32 %v831_v41, 0.0  ;;  %v3293_v36 = vunpack.c.l.bf16 %v3459_v2  ;;  %v3461_v51 = vld [vmem:[%s3945_s30 + $0xf8] sm:$0xff]   ;;  %s3750_s30 = scalar_lea.vmem %s3749_s26, 512 }
  0x89   : > { %3677 = vmatmul.mubr.msk.bf16.gmra.mxu1 %vm1055_vm0, %v1025_v61  ;;  %2166 = vbcast.lane.b32.xlu1 %v4207_v42, 312  ;;  %v663_v18 = vrot.slane %v582_v12, %v3899_v6  ;;  %v3294_v37 = vunpack.c.h.bf16 %v3459_v2  ;;  %v995_v24 = vpack.c.bf16 %v895_v14, %v894_v5  ;;  %v3421_v39 = vunpack.c.l.bf16 %v3491_v31 }
  0x8a   : > { %2162 = vbcast.lane.b32.xlu0 %v4207_v42, 304  ;;  %3616 = vmatprep.mubr.msk.bf16.mxu0 %vm1055_vm0, %v994_v11  ;;  %v4258_v38 = vrot.slane %v631_v33, %v3899_v6  ;;  %v3422_v45 = vunpack.c.h.bf16 %v3491_v31  ;;  %v1027_v49 = vpack.c.bf16 %v959_v32, %v958_v17  ;;  %v3297_v59 = vunpack.c.l.bf16 %v3460_v40 }
  0x8b   : > { %3680 = vmatprep.mubr.msk.bf16.mxu1 %vm1055_vm0, %v1026_v43  ;;  %v768_v26 = vsub.f32 %v3289_v29, %v663_v18  ;;  %v769_v20 = vsub.f32 %v3290_v21, %v663_v18  ;;  %v770_v46 = vsub.f32 %v3293_v36, %v663_v18  ;;  %v771_v22 = vsub.f32 %v3294_v37, %v663_v18 }
  0x8c   : > { %v832_v28 = vsub.f32 %v3417_v60, %v4258_v38  ;;  %v833_v34 = vsub.f32 %v3418_v35, %v4258_v38  ;;  %v834_v42 = vsub.f32 %v3421_v39, %v4258_v38  ;;  %v835_v30 = vsub.f32 %v3422_v45, %v4258_v38  ;;  %v4295_v39 = vld [vmem:[%s3906_s14 + $0x8] sm:$0xff]  ;;  %s3003_s14 = sshll.u32 %s252_s12, 4  ;;  %s5480_s14 = int_to_ptr.vmem [resolvable:$true] %s3003_s14 }
  0x8d   : > { %2177 = vbcast.lane.b32.xlu1 %v4243_v4, 264  ;;  %v896_v50 = vmax.f32 %v768_v26, 0.0  ;;  %v897_v44 = vmax.f32 %v769_v20, 0.0  ;;  %v898_v56 = vmax.f32 %v770_v46, 0.0  ;;  %v899_v25 = vmax.f32 %v771_v22, 0.0  ;;  %s3744_s23 = scalar_lea.vmem %s5480_s14, 256  ;;  %p3751_p1 = scmp.lt.s32.totalorder %s5480_s14, %s3749_s26 }
  0x8e   : > { %2173 = vbcast.lane.b32.xlu0 %v4243_v4, 256  ;;  %v4269_v52 = vpop.permute.xlu1 %1936  ;;  %v4271_v53 = vpop.permute.xlu0 %1928  ;;  %v960_v54 = vmax.f32 %v832_v28, 0.0  ;;  %v961_v55 = vmax.f32 %v833_v34, 0.0  ;;  %v962_v58 = vmax.f32 %v834_v42, 0.0  ;;  %v3298_v61 = vunpack.c.h.bf16 %v3460_v40  ;;  %p3745_p12 = scmp.ne.s32.totalorder %s5480_s14, %s3744_s23  ;;  %p3752_p2 = scmp.lt.s32.totalorder %s3750_s30, %s3744_s23 }
  0x8f   : > { %v996_v1 = vpack.c.bf16 %v897_v44, %v896_v50  ;;  %v963_v47 = vmax.f32 %v835_v30, 0.0  ;;  %v3301_v13 = vunpack.c.l.bf16 %v3461_v51  ;;  %v3302_v0 = vunpack.c.h.bf16 %v3461_v51 }
  0x90   : > { %3617 = vmatmul.mubr.msk.bf16.gmra.mxu0 %vm1055_vm0, %v995_v24  ;;  %v1028_v63 = vpack.c.bf16 %v961_v55, %v960_v54  ;;  %v772_v23 = vsub.f32 %v3297_v59, %v663_v18  ;;  %v773_v62 = vsub.f32 %v3298_v61, %v663_v18  ;;  %v3425_v41 = vunpack.c.l.bf16 %v3492_v57  ;;  %p3746_p13 = pnand %p3745_p12, %p3878_p5  ;;  %p3753_p3 = por %p3752_p2, %p3751_p1 }
  0x91   : > { %3681 = vmatmul.mubr.msk.bf16.gmra.mxu1 %vm1055_vm0, %v1027_v49  ;;  %2185 = vbcast.lane.b32.xlu1 %v4243_v4, 280  ;;  %v3426_v7 = vunpack.c.h.bf16 %v3492_v57  ;;  %v3429_v14 = vunpack.c.l.bf16 %v3493_v16  ;;  %v997_v12 = vpack.c.bf16 %v899_v25, %v898_v56  ;;  %v774_v31 = vsub.f32 %v3301_v13, %v663_v18 }
  0x92   : > { %2181 = vbcast.lane.b32.xlu0 %v4243_v4, 272  ;;  %v4279_v11 = vpop.permute.xlu1 %1940  ;;  %v4281_v5 = vpop.permute.xlu0 %1932  ;;  %3620 = vmatprep.mubr.msk.bf16.mxu0 %vm1055_vm0, %v996_v1  ;;  %v900_v2 = vmax.f32 %v772_v23, 0.0  ;;  %v901_v43 = vmax.f32 %v773_v62, 0.0  ;;  %v836_v29 = vsub.f32 %v3425_v41, %v4258_v38  ;;  %v775_v17 = vsub.f32 %v3302_v0, %v663_v18  ;;  %p3747_p0 = pneg %p3746_p13 }
  0x93   : > { %3684 = vmatprep.mubr.msk.bf16.mxu1 %vm1055_vm0, %v1028_v63  ;;  %v837_v21 = vsub.f32 %v3426_v7, %v4258_v38  ;;  %v3430_v60 = vunpack.c.h.bf16 %v3493_v16  ;;  %v1029_v35 = vpack.c.bf16 %v963_v47, %v962_v58  ;;  %v838_v36 = vsub.f32 %v3429_v14, %v4258_v38 }
  0x94   : > { %v964_v33 = vmax.f32 %v836_v29, 0.0  ;;  %v998_v45 = vpack.c.bf16 %v901_v43, %v900_v2  ;;  %v4301_v20 = vrot.slane %v4295_v39, %v2100_v19  ;;  %v4306_v46 = vrot.slane %v4295_v39, %v2135_v27  ;;  %p3754_p4 = pnand %p3753_p3, %p3747_p0 }
  0x95   : > { %2193 = vbcast.lane.b32.xlu1 %v4243_v4, 296  ;;  %v965_v32 = vmax.f32 %v837_v21, 0.0  ;;  %v839_v26 = vsub.f32 %v3430_v60, %v4258_v38  ;;  %v902_v22 = vmax.f32 %v774_v31, 0.0  ;;  %v903_v28 = vmax.f32 %v775_v17, 0.0 }
  0x96   : > { %2189 = vbcast.lane.b32.xlu0 %v4243_v4, 288  ;;  %v4290_v37 = vpop.permute.xlu1 %1948  ;;  %v4292_v24 = vpop.permute.xlu0 %1944  ;;  %v4312_v34 = vrot.slane %v4295_v39, %v2170_v48  ;;  %v2206_v19 = vrot.slane %v4295_v39, %v3899_v6  ;;  %v966_v38 = vmax.f32 %v838_v36, 0.0  ;;  %v2241_v54 = vrot.slane %v4295_v39, %v1960_v8  ;;  %v4444_v36 = vld [vmem:[%s5531_s4] ss:$0 sm:$0xff] }
  0x97   : > { %v1030_v18 = vpack.c.bf16 %v965_v32, %v964_v33  ;;  %v967_v42 = vmax.f32 %v839_v26, 0.0  ;;  %v999_v48 = vpack.c.bf16 %v903_v28, %v902_v22  ;;  %v4361_v61 = vrot.slane %v4295_v39, %v1995_v9 }
  0x98   : > { %3621 = vmatmul.mubr.msk.bf16.gmra.mxu0 %vm1055_vm0, %v997_v12  ;;  %v4371_v47 = vrot.slane %v4295_v39, %v2030_v10  ;;  %v4382_v9 = vrot.slane %v4295_v39, %v2065_v15 }
  0x99   : > { %3685 = vmatmul.mubr.msk.bf16.gmra.mxu1 %vm1055_vm0, %v1029_v35  ;;  %2201 = vbcast.lane.b32.xlu1 %v4243_v4, 312  ;;  %v1031_v40 = vpack.c.bf16 %v967_v42, %v966_v38 }
  0x9a   : > { %2197 = vbcast.lane.b32.xlu0 %v4243_v4, 304  ;;  %3624 = vmatprep.mubr.msk.bf16.mxu0 %vm1055_vm0, %v998_v45 }
  0x9b   : > { %v4320_v27 = vpop.permute.xlu1 %1956  ;;  %v4322_v30 = vpop.permute.xlu0 %1952  ;;  %3688 = vmatprep.mubr.msk.bf16.mxu1 %vm1055_vm0, %v1030_v18 }
  0x9d   : > { %2212 = vbcast.lane.b32.xlu1 %v2206_v19, 264 }
  0x9e   : > { %2208 = vbcast.lane.b32.xlu0 %v2206_v19, 256 }
  0x9f   : > { %v4325_v49 = vpop.permute.xlu1 %1967  ;;  %v4327_v50 = vpop.permute.xlu0 %1963 }
  0xa0   : > { %3625 = vmatmul.mubr.msk.bf16.gmra.mxu0 %vm1055_vm0, %v999_v48 }
  0xa1   : > { %2220 = vbcast.lane.b32.xlu1 %v2206_v19, 280  ;;  %3689 = vmatmul.mubr.msk.bf16.gmra.mxu1 %vm1055_vm0, %v1031_v40 }
  0xa2   : > { %2216 = vbcast.lane.b32.xlu0 %v2206_v19, 272 }
  0xa3   : > { %v4331_v6 = vpop.permute.xlu1 %1975  ;;  %v4333_v4 = vpop.permute.xlu0 %1971 }
  0xa5   : > { %2228 = vbcast.lane.b32.xlu1 %v2206_v19, 296 }
  0xa6   : > { %2224 = vbcast.lane.b32.xlu0 %v2206_v19, 288 }
  0xa7   : > { %v4335_v44 = vpop.permute.xlu1 %1983  ;;  %v4337_v51 = vpop.permute.xlu0 %1979 }
  0xa9   : > { %2236 = vbcast.lane.b32.xlu1 %v2206_v19, 312 }
  0xaa   : > { %2232 = vbcast.lane.b32.xlu0 %v2206_v19, 304 }
  0xab   : > { %v4342_v55 = vpop.permute.xlu1 %1991 }
  0xac   : > { %v4344_v56 = vpop.permute.xlu0 %1987 }
  0xad   : > { %2247 = vbcast.lane.b32.xlu1 %v2241_v54, 264 }
  0xae   : > { %2243 = vbcast.lane.b32.xlu0 %v2241_v54, 256 }
  0xaf   : > { %v4346_v25 = vpop.permute.xlu1 %2002 }
  0xb0   : > { %v4348_v57 = vpop.permute.xlu0 %1998 }
  0xb1   : > { %2255 = vbcast.lane.b32.xlu1 %v2241_v54, 280 }
  0xb2   : > { %2251 = vbcast.lane.b32.xlu0 %v2241_v54, 272 }
  0xb3   : > { %v4350_v1 = vpop.permute.xlu1 %2010 }
  0xb4   : > { %v4352_v58 = vpop.permute.xlu0 %2006 }
  0xb5   : > { %2263 = vbcast.lane.b32.xlu1 %v2241_v54, 296 }
  0xb6   : > { %2259 = vbcast.lane.b32.xlu0 %v2241_v54, 288 }
  0xb7   : > { %v4354_v8 = vpop.permute.xlu1 %2018 }
  0xb8   : > { %v4356_v59 = vpop.permute.xlu0 %2014 }
  0xb9   : > { %2271 = vbcast.lane.b32.xlu1 %v2241_v54, 312 }
  0xba   : > { %2267 = vbcast.lane.b32.xlu0 %v2241_v54, 304 }
  0xbb   : > { %v4363_v16 = vpop.permute.xlu1 %2026 }
  0xbc   : > { %v4365_v63 = vpop.permute.xlu0 %2022 }
  0xbd   : > { %2282 = vbcast.lane.b32.xlu1 %v4361_v61, 264 }
  0xbe   : > { %2278 = vbcast.lane.b32.xlu0 %v4361_v61, 256 }
  0xbf   : > { %v4374_v13 = vpop.permute.xlu1 %2037 }
  0xc0   : > { %v4376_v0 = vpop.permute.xlu0 %2033 }
  0xc1   : > { %2317 = vbcast.lane.b32.xlu1 %v4371_v47, 264 }
  0xc2   : > { %2313 = vbcast.lane.b32.xlu0 %v4371_v47, 256 }
  0xc3   : > { %v4385_v23 = vpop.permute.xlu1 %2045 }
  0xc4   : > { %v4387_v62 = vpop.permute.xlu0 %2041 }
  0xc5   : > { %2348 = vbcast.lane.b32.xlu1 %v4382_v9, 256 }
  0xc6   : > { %2286 = vbcast.lane.b32.xlu0 %v4361_v61, 272 }
  0xc7   : > { %v4391_v10 = vpop.permute.xlu1 %2053 }
  0xc8   : > { %v4393_v41 = vpop.permute.xlu0 %2049 }
  0xc9   : > { %2321 = vbcast.lane.b32.xlu1 %v4371_v47, 272 }
  0xca   : > { %2352 = vbcast.lane.b32.xlu0 %v4382_v9, 264 }
  0xcb   : > { %v4397_v3 = vpop.permute.xlu1 %2061 }
  0xcc   : > { %v4399_v15 = vpop.permute.xlu0 %2057 }
  0xcd   : > { %2387 = vbcast.lane.b32.xlu1 %v4301_v20, 264 }
  0xce   : > { %2383 = vbcast.lane.b32.xlu0 %v4301_v20, 256 }
  0xcf   : > { %v4403_v7 = vpop.permute.xlu1 %2072 }
  0xd0   : > { %5543 = vst [vmem:[#allocation5_spill] sm:$0xff] %v4403_v7  ;;  %v4405_v14 = vpop.permute.xlu0 %2068 }
  0xd1   : > { %2356 = vbcast.lane.b32.xlu1 %v4382_v9, 272 }
  0xd2   : > { %2290 = vbcast.lane.b32.xlu0 %v4361_v61, 280 }
  0xd3   : > { %v4409_v2 = vpop.permute.xlu1 %2080 }
  0xd4   : > { %v4411_v43 = vpop.permute.xlu0 %2076 }
  0xd5   : > { %2422 = vbcast.lane.b32.xlu1 %v4306_v46, 264 }
  0xd6   : > { %2418 = vbcast.lane.b32.xlu0 %v4306_v46, 256 }
  0xd7   : > { %v4415_v29 = vpop.permute.xlu1 %2088 }
  0xd8   : > { %5544 = vst [vmem:[#allocation6_spill] sm:$0xff] %v4415_v29  ;;  %v4417_v21 = vpop.permute.xlu0 %2084 }
  0xd9   : > { %5545 = vst [vmem:[#allocation7_spill] sm:$0xff] %v4417_v21  ;;  %2391 = vbcast.lane.b32.xlu1 %v4301_v20, 272 }
  0xda   : > { %2325 = vbcast.lane.b32.xlu0 %v4371_v47, 280 }
  0xdb   : > { %v4421_v12 = vpop.permute.xlu1 %2096 }
  0xdc   : > { %5546 = vst [vmem:[#allocation8_spill] sm:$0xff] %v4421_v12  ;;  %v4423_v31 = vpop.permute.xlu0 %2092 }
  0xdd   : > { %5547 = vst [vmem:[#allocation9_spill] sm:$0xff] %v4423_v31  ;;  %2457 = vbcast.lane.b32.xlu1 %v4312_v34, 264 }
  0xde   : > { %2453 = vbcast.lane.b32.xlu0 %v4312_v34, 256 }
  0xdf   : > { %v4427_v17 = vpop.permute.xlu1 %2107 }
  0xe0   : > { %5548 = vst [vmem:[#allocation10_spill] sm:$0xff] %v4427_v17  ;;  %v4429_v60 = vpop.permute.xlu0 %2103 }
  0xe1   : > { %5549 = vst [vmem:[#allocation11_spill] sm:$0xff] %v4429_v60  ;;  %2360 = vbcast.lane.b32.xlu1 %v4382_v9, 280 }
  0xe2   : > { %2294 = vbcast.lane.b32.xlu0 %v4361_v61, 288 }
  0xe3   : > { %v4433_v35 = vpop.permute.xlu1 %2115 }
  0xe4   : > { %5550 = vst [vmem:[#allocation12_spill] sm:$0xff] %v4433_v35  ;;  %v4435_v33 = vpop.permute.xlu0 %2111 }
  0xe5   : > { %5551 = vst [vmem:[#allocation13_spill] sm:$0xff] %v4435_v33  ;;  %2329 = vbcast.lane.b32.xlu1 %v4371_v47, 288 }
  0xe6   : > { %2426 = vbcast.lane.b32.xlu0 %v4306_v46, 272 }
  0xe7   : > { %v4439_v32 = vpop.permute.xlu1 %2123 }
  0xe8   : > { %5552 = vst [vmem:[#allocation14_spill] sm:$0xff] %v4439_v32  ;;  %v4446_v39 = vpop.permute.xlu0 %2119  ;;  %v3566_v45 = vpop.f32.mrf.mxu0 }
  0xe9   : > { %5553 = vst [vmem:[#allocation15_spill] sm:$0xff] %v4446_v39  ;;  %v3630_v26 = vpop.f32.mrf.mxu1  ;;  %2461 = vbcast.lane.b32.xlu1 %v4312_v34, 272  ;;  %v1291_v18 = vadd.f32 %v3566_v45, %v4444_v36 }
  0xea   : > { %2395 = vbcast.lane.b32.xlu0 %v4301_v20, 280  ;;  %v1282_v22 = vpop.f32.mrf.mxu0 }
  0xeb   : > { %v1283_v28 = vadd.f32 %v4444_v36, %v1282_v22  ;;  %v1538_v19 = vpop.f32.mrf.mxu1  ;;  %v4452_v38 = vpop.permute.xlu1 %2131  ;;  %v1795_v39 = vmax.f32 %v1291_v18, 0.0 }
  0xec   : > { %5554 = vst [vmem:[#allocation16_spill] sm:$0xff] %v4452_v38  ;;  %v4454_v42 = vpop.permute.xlu0 %2127  ;;  %v3567_v48 = vpop.f32.mrf.mxu0 }
  0xed   : > { %5555 = vst [vmem:[#allocation17_spill] sm:$0xff] %v4454_v42  ;;  %v1793_v40 = vmax.f32 %v1283_v28, 0.0  ;;  %v1294_v54 = vadd.f32 %v3567_v48, %v4444_v36  ;;  %v3631_v32 = vpop.f32.mrf.mxu1  ;;  %2364 = vbcast.lane.b32.xlu1 %v4382_v9, 288  ;;  %v2485_v18 = vmul.f32 %v4269_v52, %v1795_v39 }
  0xee   : > { %2298 = vbcast.lane.b32.xlu0 %v4361_v61, 296  ;;  %v1285_v45 = vpop.f32.mrf.mxu0 }
  0xef   : > { %v1286_v17 = vadd.f32 %v4444_v36, %v1285_v45  ;;  %v1541_v35 = vpop.f32.mrf.mxu1  ;;  %v4460_v22 = vpop.permute.xlu1 %2142  ;;  %v2483_v38 = vmul.f32 %v4271_v53, %v1793_v40  ;;  %v1796_v60 = vmax.f32 %v1294_v54, 0.0  ;;  %v4469_v45 = vadd.f32 %v3630_v26, %v4444_v36 }
  0xf0   : > { %5556 = vst [vmem:[#allocation18_spill] sm:$0xff] %v4460_v22  ;;  %v4463_v42 = vpop.permute.xlu0 %2138  ;;  %v3570_v28 = vpop.f32.mrf.mxu0  ;;  %v4472_v22 = vadd.f32 %v4444_v36, %v1538_v19  ;;  %v4476_v40 = vadd.f32 %v3631_v32, %v4444_v36  ;;  %v4480_v54 = vadd.f32 %v4444_v36, %v1541_v35 }
  0xf1   : > { %5557 = vst [vmem:[#allocation19_spill] sm:$0xff] %v4463_v42  ;;  %v1794_v33 = vmax.f32 %v1286_v17, 0.0  ;;  %v1307_v48 = vadd.f32 %v3570_v28, %v4444_v36  ;;  %v3634_v29 = vpop.f32.mrf.mxu1  ;;  %2333 = vbcast.lane.b32.xlu1 %v4371_v47, 296  ;;  %v2612_v26 = vsel %vm2611_vm1, %v2483_v38, -inf  ;;  %v2486_v19 = vmul.f32 %v4279_v11, %v1796_v60 }
  0xf2   : > { %2430 = vbcast.lane.b32.xlu0 %v4306_v46, 280  ;;  %v1298_v53 = vpop.f32.mrf.mxu0  ;;  %v4488_v12 = vadd.f32 %v3634_v29, %v4444_v36  ;;  %v2615_v11 = vsel %vm2611_vm1, %v2485_v18, -inf }
  0xf3   : > { %v2484_v17 = vmul.f32 %v4281_v5, %v1794_v33  ;;  %v1299_v52 = vadd.f32 %v4444_v36, %v1298_v53  ;;  %v1554_v39 = vpop.f32.mrf.mxu1  ;;  %v4483_v28 = vpop.permute.xlu1 %2150  ;;  %v1799_v42 = vmax.f32 %v1307_v48, 0.0  ;;  %v2617_v18 = vsel %vm2611_vm1, %v2486_v19, -inf }
  0xf4   : > { %5558 = vst [vmem:[#allocation20_spill] sm:$0xff] %v4483_v28  ;;  %v4490_v32 = vpop.permute.xlu0 %2146  ;;  %v3571_v21 = vpop.f32.mrf.mxu0  ;;  %v4494_v33 = vadd.f32 %v4444_v36, %v1554_v39 }
  0xf5   : > { %5559 = vst [vmem:[#allocation21_spill] sm:$0xff] %v4490_v32  ;;  %v2613_v5 = vsel %vm2611_vm1, %v2484_v17, -inf  ;;  %v1797_v35 = vmax.f32 %v1299_v52, 0.0  ;;  %v1310_v53 = vadd.f32 %v3571_v21, %v4444_v36  ;;  %v3635_v28 = vpop.f32.mrf.mxu1  ;;  %2465 = vbcast.lane.b32.xlu1 %v4312_v34, 280 }
  0xf6   : > { %v2614_v38 = vmax.f32 %v2612_v26, %v2613_v5  ;;  %2399 = vbcast.lane.b32.xlu0 %v4301_v20, 288  ;;  %v1301_v48 = vpop.f32.mrf.mxu0  ;;  %v2489_v26 = vmul.f32 %v4322_v30, %v1799_v42 }
  0xf7   : > { %v2487_v52 = vmul.f32 %v4292_v24, %v1797_v35  ;;  %v1800_v39 = vmax.f32 %v1310_v53, 0.0  ;;  %v1302_v21 = vadd.f32 %v4444_v36, %v1301_v48  ;;  %v1557_v32 = vpop.f32.mrf.mxu1  ;;  %v4505_v31 = vpop.permute.xlu1 %2158 }
  0xf8   : > { %5560 = vst [vmem:[#allocation22_spill] sm:$0xff] %v4505_v31  ;;  %v2616_v7 = vmax.f32 %v2614_v38, %v2615_v11  ;;  %v4510_v5 = vpop.permute.xlu0 %2154  ;;  %v3574_v29 = vpop.f32.mrf.mxu0  ;;  %v4518_v11 = vadd.f32 %v3635_v28, %v4444_v36  ;;  %v4521_v30 = vadd.f32 %v4444_v36, %v1557_v32 }
  0xf9   : > { %5561 = vst [vmem:[#allocation23_spill] sm:$0xff] %v4510_v5  ;;  %v1798_v35 = vmax.f32 %v1302_v21, 0.0  ;;  %v1323_v53 = vadd.f32 %v3574_v29, %v4444_v36  ;;  %v3638_v48 = vpop.f32.mrf.mxu1  ;;  %2368 = vbcast.lane.b32.xlu1 %v4382_v9, 296  ;;  %v2619_v19 = vsel %vm2611_vm1, %v2487_v52, -inf  ;;  %v2490_v38 = vmul.f32 %v4320_v27, %v1800_v39 }
  0xfa   : > { %v2618_v31 = vmax.f32 %v2616_v7, %v2617_v18  ;;  %2302 = vbcast.lane.b32.xlu0 %v4361_v61, 304  ;;  %v1314_v42 = vpop.f32.mrf.mxu0  ;;  %v2623_v52 = vsel %vm2611_vm1, %v2489_v26, -inf  ;;  %v4531_v18 = vadd.f32 %v3638_v48, %v4444_v36 }
  0xfb   : > { %v2488_v21 = vmul.f32 %v4290_v37, %v1798_v35  ;;  %v1803_v29 = vmax.f32 %v1323_v53, 0.0  ;;  %v1315_v17 = vadd.f32 %v4444_v36, %v1314_v42  ;;  %v1570_v24 = vpop.f32.mrf.mxu1  ;;  %v4527_v7 = vpop.permute.xlu1 %2166 }
  0xfc   : > { %5562 = vst [vmem:[#allocation24_spill] sm:$0xff] %v4527_v7  ;;  %v2620_v28 = vmax.f32 %v2618_v31, %v2619_v19  ;;  %v4534_v32 = vadd.f32 %v4444_v36, %v1570_v24  ;;  %v4536_v60 = vpop.permute.xlu0 %2162  ;;  %v3575_v27 = vpop.f32.mrf.mxu0 }
  0xfd   : > { %5563 = vst [vmem:[#allocation25_spill] sm:$0xff] %v4536_v60  ;;  %v2621_v37 = vsel %vm2611_vm1, %v2488_v21, -inf  ;;  %v2493_v39 = vmul.f32 %v4333_v4, %v1803_v29  ;;  %v1801_v35 = vmax.f32 %v1315_v17, 0.0  ;;  %v1326_v53 = vadd.f32 %v3575_v27, %v4444_v36  ;;  %v3639_v42 = vpop.f32.mrf.mxu1  ;;  %2337 = vbcast.lane.b32.xlu1 %v4371_v47, 304 }
  0xfe   : > { %v2622_v26 = vmax.f32 %v2620_v28, %v2621_v37  ;;  %v4545_v24 = vadd.f32 %v3639_v42, %v4444_v36  ;;  %2434 = vbcast.lane.b32.xlu0 %v4306_v46, 288  ;;  %v1317_v19 = vpop.f32.mrf.mxu0  ;;  %v2625_v21 = vsel %vm2611_vm1, %v2490_v38, -inf }
  0xff   : > { %v2491_v4 = vmul.f32 %v4327_v50, %v1801_v35  ;;  %v1804_v17 = vmax.f32 %v1326_v53, 0.0  ;;  %v1318_v29 = vadd.f32 %v4444_v36, %v1317_v19  ;;  %v1573_v27 = vpop.f32.mrf.mxu1  ;;  %v4551_v7 = vpop.permute.xlu1 %2177  ;;  %v2636_v38 = vsel %vm2611_vm1, %v2493_v39, -inf }
 0x100   : > { %5564 = vst [vmem:[#allocation26_spill] sm:$0xff] %v4551_v7  ;;  %v2624_v31 = vmax.f32 %v2622_v26, %v2623_v52  ;;  %v4556_v42 = vadd.f32 %v4444_v36, %v1573_v27  ;;  %v4558_v48 = vpop.permute.xlu0 %2173  ;;  %v3578_v5 = vpop.f32.mrf.mxu0 }
 0x101   : > { %5565 = vst [vmem:[#allocation27_spill] sm:$0xff] %v4558_v48  ;;  %v2494_v50 = vmul.f32 %v4331_v6, %v1804_v17  ;;  %v1802_v35 = vmax.f32 %v1318_v29, 0.0  ;;  %v1339_v53 = vadd.f32 %v3578_v5, %v4444_v36  ;;  %v3642_v19 = vpop.f32.mrf.mxu1  ;;  %2469 = vbcast.lane.b32.xlu1 %v4312_v34, 288  ;;  %v2633_v26 = vsel %vm2611_vm1, %v2491_v4, -inf }
 0x102   : > { %v2626_v52 = vmax.f32 %v2624_v31, %v2625_v21  ;;  %v4567_v27 = vadd.f32 %v3642_v19, %v4444_v36  ;;  %2403 = vbcast.lane.b32.xlu0 %v4301_v20, 296  ;;  %v1330_v37 = vpop.f32.mrf.mxu0 }
 0x103   : > { %v2492_v39 = vmul.f32 %v4325_v49, %v1802_v35  ;;  %v1807_v17 = vmax.f32 %v1339_v53, 0.0  ;;  %v1331_v5 = vadd.f32 %v4444_v36, %v1330_v37  ;;  %v1586_v29 = vpop.f32.mrf.mxu1  ;;  %v4573_v7 = vpop.permute.xlu1 %2185  ;;  %v2638_v21 = vsel %vm2611_vm1, %v2494_v50, -inf }
 0x104   : > { %5566 = vst [vmem:[#allocation28_spill] sm:$0xff] %v4573_v7  ;;  %v2627_v31 = vrot.slane %v2626_v52, 4  ;;  %v4578_v19 = vadd.f32 %v4444_v36, %v1586_v29  ;;  %v4580_v28 = vpop.permute.xlu0 %2181  ;;  %v3579_v48 = vpop.f32.mrf.mxu0 }
 0x105   : > { %5567 = vst [vmem:[#allocation29_spill] sm:$0xff] %v4580_v28  ;;  %v2634_v49 = vsel %vm2611_vm1, %v2492_v39, -inf  ;;  %v2497_v35 = vmul.f32 %v4344_v56, %v1807_v17  ;;  %v1805_v53 = vmax.f32 %v1331_v5, 0.0  ;;  %v1342_v37 = vadd.f32 %v3579_v48, %v4444_v36  ;;  %v3643_v6 = vpop.f32.mrf.mxu1  ;;  %2372 = vbcast.lane.b32.xlu1 %v4382_v9, 304 }
 0x106   : > { %v2628_v7 = vmax.f32 %v2626_v52, %v2627_v31  ;;  %v2635_v50 = vmax.f32 %v2633_v26, %v2634_v49  ;;  %v4588_v29 = vadd.f32 %v3643_v6, %v4444_v36  ;;  %2306 = vbcast.lane.b32.xlu0 %v4361_v61, 312  ;;  %v1333_v28 = vpop.f32.mrf.mxu0 }
 0x107   : > { %v2644_v39 = vsel %vm2611_vm1, %v2497_v35, -inf  ;;  %v2495_v56 = vmul.f32 %v4337_v51, %v1805_v53  ;;  %v1808_v17 = vmax.f32 %v1342_v37, 0.0  ;;  %v1334_v48 = vadd.f32 %v4444_v36, %v1333_v28  ;;  %v1589_v5 = vpop.f32.mrf.mxu1  ;;  %v4594_v60 = vpop.permute.xlu1 %2193 }
 0x108   : > { %5568 = vst [vmem:[#allocation30_spill] sm:$0xff] %v4594_v60  ;;  %v2629_v52 = vrot.slane %v2628_v7, 2  ;;  %v2637_v26 = vmax.f32 %v2635_v50, %v2636_v38  ;;  %v4598_v6 = vadd.f32 %v4444_v36, %v1589_v5  ;;  %v4600_v49 = vpop.permute.xlu0 %2189  ;;  %v3582_v61 = vpop.f32.mrf.mxu0 }
 0x109   : > { %5569 = vst [vmem:[#allocation31_spill] sm:$0xff] %v4600_v49  ;;  %v2640_v35 = vsel %vm2611_vm1, %v2495_v56, -inf  ;;  %v2498_v51 = vmul.f32 %v4342_v55, %v1808_v17  ;;  %v1806_v53 = vmax.f32 %v1334_v48, 0.0  ;;  %v1355_v28 = vadd.f32 %v3582_v61, %v4444_v36  ;;  %v3646_v37 = vpop.f32.mrf.mxu1  ;;  %2341 = vbcast.lane.b32.xlu1 %v4371_v47, 312 }
 0x10a   : > { %v2630_v4 = vmax.f32 %v2628_v7, %v2629_v52  ;;  %v2639_v38 = vmax.f32 %v2637_v26, %v2638_v21  ;;  %v4608_v5 = vadd.f32 %v3646_v37, %v4444_v36  ;;  %2438 = vbcast.lane.b32.xlu0 %v4306_v46, 296  ;;  %v1346_v31 = vpop.f32.mrf.mxu0 }
 0x10b   : > { %v2646_v56 = vsel %vm2611_vm1, %v2498_v51, -inf  ;;  %v2496_v55 = vmul.f32 %v4335_v44, %v1806_v53  ;;  %v1811_v17 = vmax.f32 %v1355_v28, 0.0  ;;  %v1347_v48 = vadd.f32 %v4444_v36, %v1346_v31  ;;  %v1602_v61 = vpop.f32.mrf.mxu1  ;;  %v4614_v60 = vpop.permute.xlu1 %2201 }
 0x10c   : > { %5570 = vst [vmem:[#allocation32_spill] sm:$0xff] %v4614_v60  ;;  %v2631_v47 = vrot.slane %v2630_v4, 1  ;;  %v2641_v7 = vmax.f32 %v2639_v38, %v2640_v35  ;;  %v4618_v52 = vadd.f32 %v4444_v36, %v1602_v61  ;;  %v4620_v26 = vpop.permute.xlu0 %2197  ;;  %v3583_v37 = vpop.f32.mrf.mxu0 }
 0x10d   : > { %5571 = vst [vmem:[#allocation33_spill] sm:$0xff] %v4620_v26  ;;  %v2642_v51 = vsel %vm2611_vm1, %v2496_v55, -inf  ;;  %v2501_v44 = vmul.f32 %v4352_v58, %v1811_v17  ;;  %v1809_v53 = vmax.f32 %v1347_v48, 0.0  ;;  %v1358_v31 = vadd.f32 %v3583_v37, %v4444_v36  ;;  %v3647_v28 = vpop.f32.mrf.mxu1  ;;  %2473 = vbcast.lane.b32.xlu1 %v4312_v34, 296 }
 0x10e   : > { %v4626_v50 = vmax.f32 %v2630_v4, %v2631_v47  ;;  %v2643_v35 = vmax.f32 %v2641_v7, %v2642_v51  ;;  %v4630_v61 = vadd.f32 %v3647_v28, %v4444_v36  ;;  %2407 = vbcast.lane.b32.xlu0 %v4301_v20, 304  ;;  %v1349_v21 = vpop.f32.mrf.mxu0  ;;  %v5572_v51 = vmax.f32 %v4480_v54, 0.0 }
 0x10f   : > { %v2657_v55 = vsel %vm2611_vm1, %v2501_v44, -inf  ;;  %v2499_v58 = vmul.f32 %v4348_v57, %v1809_v53  ;;  %v1812_v17 = vmax.f32 %v1358_v31, 0.0  ;;  %v1350_v48 = vadd.f32 %v4444_v36, %v1349_v21  ;;  %v1605_v37 = vpop.f32.mrf.mxu1  ;;  %v2213_v60 = vpop.permute.xlu1 %2212 }
 0x110   : > { %v2645_v4 = vmax.f32 %v2643_v35, %v2644_v39  ;;  %v4638_v7 = vadd.f32 %v4444_v36, %v1605_v37  ;;  %v2548_v28 = vmul.f32 %v2213_v60, %v5572_v51  ;;  %v2209_v38 = vpop.permute.xlu0 %2208  ;;  %v3586_v49 = vpop.f32.mrf.mxu0  ;;  %v5573_v21 = vmax.f32 %v4472_v22, 0.0 }
 0x111   : > { %v2654_v44 = vsel %vm2611_vm1, %v2499_v58, -inf  ;;  %v2502_v57 = vmul.f32 %v4350_v1, %v1812_v17  ;;  %v1810_v53 = vmax.f32 %v1350_v48, 0.0  ;;  %v3650_v26 = vpop.f32.mrf.mxu1  ;;  %2442 = vbcast.lane.b32.xlu1 %v4306_v46, 304  ;;  %v1371_v54 = vadd.f32 %v3586_v49, %v4444_v36 }
 0x112   : > { %v2547_v31 = vmul.f32 %v2209_v38, %v5573_v21  ;;  %v2647_v39 = vmax.f32 %v2645_v4, %v2646_v56  ;;  %v2781_v37 = vsel %vm2611_vm1, %v2548_v28, -inf  ;;  %2376 = vbcast.lane.b32.xlu0 %v4382_v9, 312  ;;  %v1362_v60 = vpop.f32.mrf.mxu0  ;;  %v4655_v38 = vadd.f32 %v3650_v26, %v4444_v36 }
 0x113   : > { %v2659_v58 = vsel %vm2611_vm1, %v2502_v57, -inf  ;;  %v2500_v1 = vmul.f32 %v4346_v25, %v1810_v53  ;;  %v1618_v17 = vpop.f32.mrf.mxu1  ;;  %v2221_v56 = vpop.permute.xlu1 %2220  ;;  %v1815_v51 = vmax.f32 %v1371_v54, 0.0  ;;  %v1363_v28 = vadd.f32 %v4444_v36, %v1362_v60 }
 0x114   : > { %v2780_v22 = vsel %vm2611_vm1, %v2547_v31, -inf  ;;  %5574 = vst [vmem:[#allocation34_spill] sm:$0xff] %v4655_v38  ;;  %v2648_v48 = vrot.slane %v2647_v39, 4  ;;  %v2217_v49 = vpop.permute.xlu0 %2216  ;;  %v3587_v21 = vpop.f32.mrf.mxu0  ;;  %v4661_v25 = vadd.f32 %v4444_v36, %v1618_v17  ;;  %v5575_v53 = vmax.f32 %v4476_v40, 0.0 }
 0x115   : > { %v2782_v4 = vmax.f32 %v2780_v22, %v2781_v37  ;;  %v2655_v9 = vsel %vm2611_vm1, %v2500_v1, -inf  ;;  %v3651_v31 = vpop.f32.mrf.mxu1  ;;  %2477 = vbcast.lane.b32.xlu1 %v4312_v34, 304  ;;  %v2505_v54 = vmul.f32 %v4365_v63, %v1815_v51  ;;  %v1813_v60 = vmax.f32 %v1363_v28, 0.0 }
 0x116   : > { %v2550_v26 = vmul.f32 %v2221_v56, %v5575_v53  ;;  %v2649_v47 = vmax.f32 %v2647_v39, %v2648_v48  ;;  %v2656_v37 = vmax.f32 %v2654_v44, %v2655_v9  ;;  %2411 = vbcast.lane.b32.xlu0 %v4301_v20, 312  ;;  %v1365_v22 = vpop.f32.mrf.mxu0  ;;  %v5576_v17 = vmax.f32 %v4469_v45, 0.0 }
 0x117   : > { %v1374_v40 = vadd.f32 %v3587_v21, %v4444_v36  ;;  %v1621_v56 = vpop.f32.mrf.mxu1  ;;  %v2229_v53 = vpop.permute.xlu1 %2228  ;;  %v2665_v44 = vsel %vm2611_vm1, %v2505_v54, -inf  ;;  %v2503_v63 = vmul.f32 %v4356_v59, %v1813_v60  ;;  %v4677_v9 = vadd.f32 %v3651_v31, %v4444_v36 }
 0x118   : > { %v2785_v57 = vsel %vm2611_vm1, %v2550_v26, -inf  ;;  %v2549_v35 = vmul.f32 %v2217_v49, %v5576_v17  ;;  %v2650_v38 = vrot.slane %v2649_v47, 2  ;;  %v2658_v39 = vmax.f32 %v2656_v37, %v2657_v55  ;;  %v2225_v48 = vpop.permute.xlu0 %2224  ;;  %v3590_v20 = vpop.f32.mrf.mxu0 }
 0x119   : > { %v1816_v28 = vmax.f32 %v1374_v40, 0.0  ;;  %5577 = vst [vmem:[#allocation35_spill] sm:$0xff] %v4677_v9  ;;  %v1366_v45 = vadd.f32 %v4444_v36, %v1365_v22  ;;  %v3654_v49 = vpop.f32.mrf.mxu1  ;;  %2481 = vbcast.lane.b32.xlu1 %v4312_v34, 312  ;;  %v2661_v55 = vsel %vm2611_vm1, %v2503_v63, -inf  ;;  %v4686_v31 = vadd.f32 %v4444_v36, %v1621_v56 }
 0x11a   : > { %v2783_v51 = vsel %vm2611_vm1, %v2549_v35, -inf  ;;  %v2651_v21 = vmax.f32 %v2649_v47, %v2650_v38  ;;  %v2660_v26 = vmax.f32 %v2658_v39, %v2659_v58  ;;  %2446 = vbcast.lane.b32.xlu0 %v4306_v46, 312  ;;  %v1378_v59 = vpop.f32.mrf.mxu0  ;;  %v5578_v47 = vmax.f32 %v4521_v30, 0.0 }
 0x11b   : > { %v2784_v37 = vmax.f32 %v2782_v4, %v2783_v51  ;;  %v2506_v54 = vmul.f32 %v4363_v16, %v1816_v28  ;;  %v1814_v60 = vmax.f32 %v1366_v45, 0.0  ;;  %v1634_v22 = vpop.f32.mrf.mxu1  ;;  %v2237_v17 = vpop.permute.xlu1 %2236  ;;  %v5579_v38 = vmax.f32 %v4494_v33, 0.0 }
 0x11c   : > { %v2652_v40 = vrot.slane %v2651_v21, 1  ;;  %v2662_v34 = vmax.f32 %v2660_v26, %v2661_v55  ;;  %v2552_v58 = vmul.f32 %v2229_v53, %v5578_v47  ;;  %v2233_v46 = vpop.permute.xlu0 %2232  ;;  %v3591_v39 = vpop.f32.mrf.mxu0  ;;  %v1387_v53 = vadd.f32 %v3590_v20, %v4444_v36 }
 0x11d   : > { %v2551_v4 = vmul.f32 %v2225_v48, %v5579_v38  ;;  %v2667_v16 = vsel %vm2611_vm1, %v2506_v54, -inf  ;;  %v2504_v63 = vmul.f32 %v4354_v8, %v1814_v60  ;;  %v2786_v56 = vmax.f32 %v2784_v37, %v2785_v57  ;;  %v3655_v28 = vpop.f32.mrf.mxu1 }
 0x11e   : > { %v4695_v45 = vmax.f32 %v2651_v21, %v2652_v40  ;;  %v2789_v26 = vsel %vm2611_vm1, %v2552_v58, -inf  ;;  %v1381_v33 = vpop.f32.mrf.mxu0  ;;  %v4702_v54 = vadd.f32 %v3654_v49, %v4444_v36  ;;  %v1379_v8 = vadd.f32 %v4444_v36, %v1378_v59 }
 0x11f   : > { %v2787_v30 = vsel %vm2611_vm1, %v2551_v4, -inf  ;;  %v2663_v48 = vsel %vm2611_vm1, %v2504_v63, -inf  ;;  %v1637_v60 = vpop.f32.mrf.mxu1  ;;  %v2248_v57 = vpop.permute.xlu1 %2247  ;;  %v1819_v21 = vmax.f32 %v1387_v53, 0.0  ;;  %v4706_v40 = vadd.f32 %v4444_v36, %v1634_v22 }
 0x120   : > { %v2788_v55 = vmax.f32 %v2786_v56, %v2787_v30  ;;  %v2664_v37 = vmax.f32 %v2662_v34, %v2663_v48  ;;  %v5580_v47 = vmax.f32 %v4518_v11, 0.0  ;;  %v2244_v20 = vpop.permute.xlu0 %2243  ;;  %v3594_v38 = vpop.f32.mrf.mxu0  ;;  %v1817_v63 = vmax.f32 %v1379_v8, 0.0 }
 0x121   : > { %v5581_v49 = vmax.f32 %v4488_v12, 0.0  ;;  %v3658_v59 = vpop.f32.mrf.mxu1  ;;  %v2509_v34 = vmul.f32 %v4387_v62, %v1819_v21  ;;  %v4720_v8 = vadd.f32 %v3655_v28, %v4444_v36 }
 0x122   : > { %v2554_v58 = vmul.f32 %v2237_v17, %v5580_v47  ;;  %v2790_v30 = vmax.f32 %v2788_v55, %v2789_v26  ;;  %v2666_v35 = vmax.f32 %v2664_v37, %v2665_v44  ;;  %v1394_v48 = vpop.f32.mrf.mxu0  ;;  %v2507_v11 = vmul.f32 %v4376_v0, %v1817_v63 }
 0x123   : > { %v2553_v56 = vmul.f32 %v2233_v46, %v5581_v49  ;;  %v1390_v47 = vadd.f32 %v3591_v39, %v4444_v36  ;;  %v1650_v12 = vpop.f32.mrf.mxu1  ;;  %v2256_v46 = vpop.permute.xlu1 %2255  ;;  %v2678_v44 = vsel %vm2611_vm1, %v2509_v34, -inf  ;;  %v1382_v55 = vadd.f32 %v4444_v36, %v1381_v33 }
 0x124   : > { %v2793_v22 = vsel %vm2611_vm1, %v2554_v58, -inf  ;;  %v2668_v26 = vmax.f32 %v2666_v35, %v2667_v16  ;;  %v2252_v37 = vpop.permute.xlu0 %2251  ;;  %v3595_v21 = vpop.f32.mrf.mxu0  ;;  %v2675_v58 = vsel %vm2611_vm1, %v2507_v11, -inf  ;;  %v4727_v39 = vadd.f32 %v4444_v36, %v1637_v60 }
 0x125   : > { %v2791_v17 = vsel %vm2611_vm1, %v2553_v56, -inf  ;;  %v1820_v0 = vmax.f32 %v1390_v47, 0.0  ;;  %v3659_v28 = vpop.f32.mrf.mxu1  ;;  %v1818_v51 = vmax.f32 %v1382_v55, 0.0  ;;  %v5582_v35 = vmax.f32 %v4556_v42, 0.0 }
 0x126   : > { %v2792_v62 = vmax.f32 %v2790_v30, %v2791_v17  ;;  %v2669_v49 = vrot.slane %v2668_v26, 4  ;;  %v1397_v30 = vpop.f32.mrf.mxu0  ;;  %v5583_v11 = vmax.f32 %v4534_v32, 0.0  ;;  %v1403_v47 = vadd.f32 %v3594_v38, %v4444_v36 }
 0x127   : > { %v2556_v16 = vmul.f32 %v2248_v57, %v5582_v35  ;;  %v2510_v33 = vmul.f32 %v4385_v23, %v1820_v0  ;;  %v1653_v1 = vpop.f32.mrf.mxu1  ;;  %v2264_v60 = vpop.permute.xlu1 %2263  ;;  %v4743_v32 = vadd.f32 %v3658_v59, %v4444_v36  ;;  %v4752_v34 = vadd.f32 %v4444_v36, %v1650_v12 }
 0x128   : > { %v2794_v56 = vmax.f32 %v2792_v62, %v2793_v22  ;;  %v2555_v17 = vmul.f32 %v2244_v20, %v5583_v11  ;;  %v2670_v63 = vmax.f32 %v2668_v26, %v2669_v49  ;;  %v2508_v22 = vmul.f32 %v4374_v13, %v1818_v51  ;;  %v2260_v42 = vpop.permute.xlu0 %2259  ;;  %v4738_v57 = vpop.f32.mrf.mxu0 }
 0x129   : > { %v2802_v62 = vsel %vm2611_vm1, %v2556_v16, -inf  ;;  %v2680_v23 = vsel %vm2611_vm1, %v2510_v33, -inf  ;;  %v1823_v0 = vmax.f32 %v1403_v47, 0.0  ;;  %5584 = vst [vmem:[#allocation36_spill] sm:$0xff] %v4743_v32  ;;  %v3662_v20 = vpop.f32.mrf.mxu1  ;;  %v1395_v33 = vadd.f32 %v4444_v36, %v1394_v48 }
 0x12a   : > { %v2795_v4 = vrot.slane %v2794_v56, 4  ;;  %v2801_v55 = vsel %vm2611_vm1, %v2555_v17, -inf  ;;  %v2671_v38 = vrot.slane %v2670_v63, 2  ;;  %v2676_v26 = vsel %vm2611_vm1, %v2508_v22, -inf  ;;  %v1410_v13 = vpop.f32.mrf.mxu0 }
 0x12b   : > { %v2803_v49 = vmax.f32 %v2801_v55, %v2802_v62  ;;  %v2677_v51 = vmax.f32 %v2675_v58, %v2676_v26  ;;  %v2513_v16 = vmul.f32 %v4399_v15, %v1823_v0  ;;  %v1666_v53 = vpop.f32.mrf.mxu1  ;;  %v4749_v17 = vpop.permute.xlu1 %2271  ;;  %v1821_v55 = vmax.f32 %v1395_v33, 0.0 }
 0x12c   : > { %v2796_v35 = vmax.f32 %v2794_v56, %v2795_v4  ;;  %v2672_v47 = vmax.f32 %v2670_v63, %v2671_v38  ;;  %v5585_v4 = vmax.f32 %v4545_v24, 0.0  ;;  %v2268_v22 = vpop.permute.xlu0 %2267  ;;  %v4756_v62 = vpop.f32.mrf.mxu0  ;;  %v5586_v48 = vmax.f32 %v4531_v18, 0.0 }
 0x12d   : > { %v2679_v58 = vmax.f32 %v2677_v51, %v2678_v44  ;;  %v4759_v15 = vsel %vm2611_vm1, %v2513_v16, -inf  ;;  %v4763_v26 = vpop.f32.mrf.mxu1  ;;  %v2511_v44 = vmul.f32 %v4393_v41, %v1821_v55  ;;  %v1406_v33 = vadd.f32 %v3595_v21, %v4444_v36 }
 0x12e   : > { %v2797_v59 = vrot.slane %v2796_v35, 2  ;;  %v2558_v56 = vmul.f32 %v2256_v46, %v5585_v4  ;;  %v2557_v0 = vmul.f32 %v2252_v37, %v5586_v48  ;;  %v2673_v63 = vrot.slane %v2672_v47, 1  ;;  %v4767_v46 = vpop.f32.mrf.mxu0 }
 0x12f   : > { %v2681_v51 = vmax.f32 %v2679_v58, %v2680_v23  ;;  %v4772_v18 = vpop.f32.mrf.mxu1  ;;  %v4774_v37 = vpop.permute.xlu1 %2282  ;;  %v2682_v41 = vsel %vm2611_vm1, %v2511_v44, -inf  ;;  %v1824_v23 = vmax.f32 %v1406_v33, 0.0  ;;  %v1398_v21 = vadd.f32 %v4444_v36, %v1397_v30 }
 0x130   : > { %v2798_v38 = vmax.f32 %v2796_v35, %v2797_v59  ;;  %v2806_v24 = vsel %vm2611_vm1, %v2558_v56, -inf  ;;  %v2804_v16 = vsel %vm2611_vm1, %v2557_v0, -inf  ;;  %v4776_v4 = vmax.f32 %v2672_v47, %v2673_v63  ;;  %v4781_v48 = vpop.permute.xlu0 %2278  ;;  %v4783_v11 = vpop.f32.mrf.mxu0 }
 0x131   : > { %v2805_v59 = vmax.f32 %v2803_v49, %v2804_v16  ;;  %v4779_v56 = vadd.f32 %v3659_v28, %v4444_v36  ;;  %v4788_v58 = vadd.f32 %v4444_v36, %v1653_v1  ;;  %v4790_v55 = vpop.f32.mrf.mxu1  ;;  %v2683_v49 = vmax.f32 %v2681_v51, %v2682_v41 }
 0x132   : > { %5587 = vst [vmem:[#allocation37_spill] sm:$0xff] %v4776_v4  ;;  %v2799_v35 = vrot.slane %v2798_v38, 1  ;;  %v5589_v0 = vmax.f32 %v4598_v6, 0.0  ;;  %v4797_v16 = vpop.f32.mrf.mxu0  ;;  %v2514_v44 = vmul.f32 %v4397_v3, %v1824_v23  ;;  %v1822_v33 = vmax.f32 %v1398_v21, 0.0 }
 0x133   : > { %5588 = vst [vmem:[#allocation38_spill] sm:$0xff] %v4779_v56  ;;  %v5590_v1 = vmax.f32 %v4578_v19, 0.0  ;;  %v4803_v4 = vpop.f32.mrf.mxu1  ;;  %v1419_v6 = vadd.f32 %v4738_v57, %v4444_v36  ;;  %v1411_v21 = vadd.f32 %v4444_v36, %v1410_v13  ;;  %v5592_v13 = vmax.f32 %v4567_v27, 0.0 }
 0x134   : > { %v4792_v47 = vmax.f32 %v2798_v38, %v2799_v35  ;;  %v2560_v63 = vmul.f32 %v2264_v60, %v5589_v0  ;;  %v4805_v38 = vpop.permute.xlu1 %2317  ;;  %v2807_v35 = vmax.f32 %v2805_v59, %v2806_v24  ;;  %v4811_v60 = vadd.f32 %v3662_v20, %v4444_v36  ;;  %v4813_v3 = vpop.permute.xlu0 %2313 }
 0x135   : > { %v2559_v12 = vmul.f32 %v2260_v42, %v5590_v1  ;;  %v4815_v41 = vpop.f32.mrf.mxu0  ;;  %v2688_v19 = vsel %vm2611_vm1, %v2514_v44, -inf  ;;  %v2512_v42 = vmul.f32 %v4391_v10, %v1822_v33  ;;  %v4821_v0 = vpop.f32.mrf.mxu1  ;;  %v1827_v59 = vmax.f32 %v1419_v6, 0.0 }
 0x136   : > { %v2810_v51 = vsel %vm2611_vm1, %v2560_v63, -inf  ;;  %v4825_v20 = vadd.f32 %v4444_v36, %v1666_v53  ;;  %v1825_v44 = vmax.f32 %v1411_v21, 0.0  ;;  %v5591_v10 = vmax.f32 %v4588_v29, 0.0 }
 0x137   : > { %v2808_v23 = vsel %vm2611_vm1, %v2559_v12, -inf  ;;  %v4827_v63 = vpop.f32.mrf.mxu0  ;;  %v2684_v1 = vsel %vm2611_vm1, %v2512_v42, -inf  ;;  %v2561_v33 = vmul.f32 %v2268_v22, %v5592_v13  ;;  %v4835_v28 = vpop.f32.mrf.mxu1  ;;  %v2517_v53 = vmul.f32 %v4411_v43, %v1827_v59 }
 0x138   : > { %v2809_v24 = vmax.f32 %v2807_v35, %v2808_v23  ;;  %v2562_v12 = vmul.f32 %v4749_v17, %v5591_v10  ;;  %v4837_v35 = vpop.permute.xlu1 %2348  ;;  %v2685_v6 = vmax.f32 %v2683_v49, %v2684_v1  ;;  %v4841_v57 = vpop.permute.xlu0 %2286  ;;  %v2515_v29 = vmul.f32 %v4405_v14, %v1825_v44 }
 0x139   : > { %v4843_v42 = vpop.f32.mrf.mxu0  ;;  %v2812_v27 = vsel %vm2611_vm1, %v2561_v33, -inf  ;;  %v4851_v22 = vsel %vm2964_vm2, %v4695_v45, %v4626_v50  ;;  %v4853_v49 = vpop.f32.mrf.mxu1  ;;  %v4864_v1 = vadd.f32 %v4763_v26, %v4444_v36  ;;  %v1414_v50 = vadd.f32 %v4444_v36, %v4767_v46 }
 0x13a   : > { %v2811_v30 = vmax.f32 %v2809_v24, %v2810_v51  ;;  %v2814_v17 = vsel %vm2611_vm1, %v2562_v12, -inf  ;;  %5593 = vst [vmem:[#allocation39_spill] sm:$0xff] %v4851_v22  ;;  %v2687_v43 = vmax.f32 %v2685_v6, %v4759_v15  ;;  %v2699_v51 = vsel %vm2611_vm1, %v2517_v53, -inf }
 0x13b   : > { %v1422_v24 = vadd.f32 %v4756_v62, %v4444_v36  ;;  %v4859_v14 = vpop.f32.mrf.mxu0  ;;  %v2696_v59 = vsel %vm2611_vm1, %v2515_v29, -inf  ;;  %v4870_v45 = vadd.f32 %v4444_v36, %v4772_v18  ;;  %v4872_v15 = vpop.f32.mrf.mxu1  ;;  %v5594_v12 = vmax.f32 %v4638_v7, 0.0 }
 0x13c   : > { %v2813_v21 = vmax.f32 %v2811_v30, %v2812_v27  ;;  %v4874_v30 = vpop.permute.xlu1 %2321  ;;  %v2689_v62 = vmax.f32 %v2687_v43, %v2688_v19  ;;  %v4879_v26 = vpop.permute.xlu0 %2352  ;;  %v1826_v6 = vmax.f32 %v1414_v50, 0.0  ;;  %v5595_v53 = vmax.f32 %v4618_v52, 0.0 }
 0x13d   : > { %v1828_v10 = vmax.f32 %v1422_v24, 0.0  ;;  %v2564_v13 = vmul.f32 %v4774_v37, %v5594_v12  ;;  %v4881_v33 = vpop.f32.mrf.mxu0  ;;  %v4888_v19 = vpop.f32.mrf.mxu1  ;;  %v1435_v52 = vadd.f32 %v4783_v11, %v4444_v36  ;;  %v1427_v18 = vadd.f32 %v4444_v36, %v4797_v16 }
 0x13e   : > { %v2815_v44 = vmax.f32 %v2813_v21, %v2814_v17  ;;  %v2563_v29 = vmul.f32 %v4781_v48, %v5595_v53  ;;  %v2690_v17 = vrot.slane %v2689_v62, 4  ;;  %v5596_v21 = vld [vmem:[#allocation5_spill] sm:$0xff]  ;;  %v4904_v48 = vadd.f32 %v4790_v55, %v4444_v36 }
 0x13f   : > { %v2518_v7 = vmul.f32 %v4409_v2, %v1828_v10  ;;  %v4892_v37 = vsel %vm2611_vm1, %v2564_v13, -inf  ;;  %v4894_v43 = vpop.f32.mrf.mxu0  ;;  %v2516_v24 = vmul.f32 %v5596_v21, %v1826_v6  ;;  %v4906_v12 = vpop.f32.mrf.mxu1  ;;  %v1831_v46 = vmax.f32 %v1435_v52, 0.0  ;;  %v5598_v6 = vld [vmem:[#allocation9_spill] sm:$0xff] }
 0x140   : > { %v2816_v27 = vrot.slane %v2815_v44, 4  ;;  %v4898_v50 = vsel %vm2611_vm1, %v2563_v29, -inf  ;;  %5597 = vst [vmem:[#allocation5_spill] sm:$0xff] %v4904_v48  ;;  %v4908_v2 = vpop.permute.xlu1 %2387  ;;  %v2691_v10 = vmax.f32 %v2689_v62, %v2690_v17  ;;  %v4913_v29 = vpop.permute.xlu0 %2383  ;;  %v5599_v52 = vmax.f32 %v4727_v39, 0.0 }
 0x141   : > { %v2701_v53 = vsel %vm2611_vm1, %v2518_v7, -inf  ;;  %v4915_v21 = vpop.f32.mrf.mxu0  ;;  %v2697_v11 = vsel %vm2611_vm1, %v2516_v24, -inf  ;;  %v4921_v23 = vpop.f32.mrf.mxu1  ;;  %v2521_v56 = vmul.f32 %v5598_v6, %v1831_v46  ;;  %v1829_v24 = vmax.f32 %v1427_v18, 0.0 }
 0x142   : > { %v2817_v13 = vmax.f32 %v2815_v44, %v2816_v27  ;;  %v2692_v62 = vrot.slane %v2691_v10, 2  ;;  %v2698_v17 = vmax.f32 %v2696_v59, %v2697_v11  ;;  %v4925_v27 = vadd.f32 %v4444_v36, %v4803_v4 }
 0x143   : > { %v4927_v7 = vpop.f32.mrf.mxu0  ;;  %v2572_v55 = vmul.f32 %v4805_v38, %v5599_v52  ;;  %v5600_v16 = vmax.f32 %v4706_v40, 0.0  ;;  %v4936_v9 = vpop.f32.mrf.mxu1  ;;  %v2707_v39 = vsel %vm2611_vm1, %v2521_v56, -inf  ;;  %v5601_v38 = vld [vmem:[#allocation7_spill] sm:$0xff] }
 0x144   : > { %v2818_v44 = vrot.slane %v2817_v13, 2  ;;  %v4938_v59 = vpop.permute.xlu1 %2356  ;;  %v2693_v11 = vmax.f32 %v2691_v10, %v2692_v62  ;;  %v2700_v4 = vmax.f32 %v2698_v17, %v2699_v51  ;;  %v4941_v32 = vpop.permute.xlu0 %2290  ;;  %v2519_v18 = vmul.f32 %v5601_v38, %v1829_v24 }
 0x145   : > { %v2571_v22 = vmul.f32 %v4813_v3, %v5600_v16  ;;  %v4943_v46 = vpop.f32.mrf.mxu0  ;;  %v4948_v40 = vsel %vm2611_vm1, %v2572_v55, -inf  ;;  %v4953_v6 = vpop.f32.mrf.mxu1  ;;  %v4963_v55 = vld [vmem:[%s5531_s4] ss:$0 sm:$0xff] }
 0x146   : > { %v2819_v36 = vmax.f32 %v2817_v13, %v2818_v44  ;;  %v2694_v10 = vrot.slane %v2693_v11, 1  ;;  %v2702_v13 = vmax.f32 %v2700_v4, %v2701_v53  ;;  %v2703_v56 = vsel %vm2611_vm1, %v2519_v18, -inf }
 0x147   : > { %v4951_v3 = vsel %vm2611_vm1, %v2571_v22, -inf  ;;  %v4957_v44 = vpop.f32.mrf.mxu0  ;;  %v1438_v22 = vadd.f32 %v4963_v55, %v4815_v41  ;;  %v4969_v17 = vadd.f32 %v4963_v55, %v4821_v0  ;;  %v1430_v53 = vadd.f32 %v4963_v55, %v4827_v63 }
 0x148   : > { %v2820_v51 = vrot.slane %v2819_v36, 1  ;;  %v2845_v62 = vmax.f32 %v4951_v3, %v4948_v40  ;;  %v4973_v24 = vpop.permute.xlu1 %2422  ;;  %v4975_v52 = vmax.f32 %v2693_v11, %v2694_v10  ;;  %v2704_v4 = vmax.f32 %v2702_v13, %v2703_v56  ;;  %v4981_v18 = vpop.permute.xlu0 %2418 }
 0x149   : > { %5602 = vst [vmem:[#allocation9_spill] sm:$0xff] %v4969_v17  ;;  %v4979_v38 = vadd.f32 %v4963_v55, %v4835_v28  ;;  %v4983_v41 = vpop.f32.mrf.mxu0  ;;  %v1832_v40 = vmax.f32 %v1438_v22, 0.0  ;;  %v1830_v3 = vmax.f32 %v1430_v53, 0.0  ;;  %v5603_v63 = vmax.f32 %v4825_v20, 0.0  ;;  %v4989_v11 = vpop.f32.mrf.mxu1  ;;  %v5606_v20 = vld [vmem:[#allocation8_spill] sm:$0xff] }
 0x14a   : > { %v2821_v16 = vmax.f32 %v2819_v36, %v2820_v51  ;;  %v5605_v10 = vmax.f32 %v4608_v5, 0.0  ;;  %v1451_v13 = vadd.f32 %v4963_v55, %v4843_v42  ;;  %v1443_v42 = vadd.f32 %v4963_v55, %v4859_v14  ;;  %v5609_v14 = vld [vmem:[#allocation13_spill] sm:$0xff] }
 0x14b   : > { %v2579_v48 = vmul.f32 %v4837_v35, %v5603_v63  ;;  %v5001_v56 = vpop.f32.mrf.mxu0  ;;  %v2522_v22 = vmul.f32 %v5606_v20, %v1832_v40  ;;  %v5607_v35 = vld [vmem:[#allocation6_spill] sm:$0xff]  ;;  %v1699_v40 = vadd.f32 %v4963_v55, %v4872_v15  ;;  %v5611_v17 = vmax.f32 %v4870_v45, 0.0 }
 0x14c   : > { %v4993_v36 = vsel %vm2964_vm2, %v2821_v16, %v4792_v47  ;;  %v2565_v51 = vmul.f32 %v4841_v57, %v5605_v10  ;;  %v2520_v53 = vmul.f32 %v5607_v35, %v1830_v3  ;;  %v5010_v47 = vadd.f32 %v4963_v55, %v4853_v49  ;;  %v5012_v16 = vpop.permute.xlu1 %2391  ;;  %v5019_v10 = vpop.permute.xlu0 %2325 }
 0x14d   : > { %5604 = vst [vmem:[#allocation7_spill] sm:$0xff] %v4993_v36  ;;  %v5006_v63 = vsel %vm2611_vm1, %v2579_v48, -inf  ;;  %v1835_v57 = vmax.f32 %v1451_v13, 0.0  ;;  %v2709_v48 = vsel %vm2611_vm1, %v2522_v22, -inf  ;;  %v5608_v49 = vmax.f32 %v4898_v50, %v4892_v37  ;;  %v5029_v13 = vpop.f32.mrf.mxu1  ;;  %v5032_v36 = vpop.f32.mrf.mxu0 }
 0x14e   : > { %v2825_v5 = vsel %vm2611_vm1, %v2565_v51, -inf  ;;  %v2705_v3 = vsel %vm2611_vm1, %v2520_v53, -inf  ;;  %v1833_v28 = vmax.f32 %v1443_v42, 0.0  ;;  %v1897_v15 = vmax.f32 %v1699_v40, 0.0  ;;  %v5612_v40 = vld [vmem:[#allocation11_spill] sm:$0xff] }
 0x14f   : > { %v5026_v20 = vmax.f32 %v5608_v49, %v2825_v5  ;;  %v2706_v35 = vmax.f32 %v2704_v4, %v2705_v3  ;;  %v2525_v0 = vmul.f32 %v5609_v14, %v1835_v57  ;;  %v5610_v22 = vmax.f32 %v4702_v54, 0.0  ;;  %v5057_v3 = vpop.f32.mrf.mxu1 }
 0x150   : > { %v2580_v37 = vmul.f32 %v4879_v26, %v5611_v17  ;;  %v1454_v50 = vadd.f32 %v4963_v55, %v4881_v33  ;;  %v5044_v4 = vadd.f32 %v4963_v55, %v4888_v19  ;;  %v5046_v5 = vpop.permute.xlu1 %2457  ;;  %v2523_v54 = vmul.f32 %v5612_v40, %v1833_v28  ;;  %v5052_v45 = vpop.permute.xlu0 %2453 }
 0x151   : > { %v2573_v53 = vmul.f32 %v4874_v30, %v5610_v22  ;;  %v2708_v57 = vmax.f32 %v2706_v35, %v2707_v39  ;;  %v2720_v42 = vsel %vm2611_vm1, %v2525_v0, -inf  ;;  %v1446_v30 = vadd.f32 %v4963_v55, %v4894_v43  ;;  %v5063_v35 = vpop.f32.mrf.mxu0  ;;  %v5613_v43 = vld [vmem:[#allocation12_spill] sm:$0xff] }
 0x152   : > { %v2865_v33 = vsel %vm2611_vm1, %v2580_v37, -inf  ;;  %v1836_v17 = vmax.f32 %v1454_v50, 0.0  ;;  %v2717_v39 = vsel %vm2611_vm1, %v2523_v54, -inf  ;;  %v2587_v37 = vmul.f32 %v4913_v29, %v1897_v15 }
 0x153   : > { %v2846_v26 = vsel %vm2611_vm1, %v2573_v53, -inf  ;;  %v2710_v49 = vmax.f32 %v2708_v57, %v2709_v48  ;;  %v2866_v28 = vmax.f32 %v5006_v63, %v2865_v33  ;;  %v1834_v22 = vmax.f32 %v1446_v30, 0.0 }
 0x154   : > { %v5060_v0 = vmax.f32 %v2845_v62, %v2846_v26  ;;  %v2526_v14 = vmul.f32 %v5613_v43, %v1836_v17  ;;  %v1702_v53 = vadd.f32 %v4963_v55, %v4906_v12  ;;  %v5069_v50 = vpop.permute.xlu1 %2360  ;;  %v1467_v48 = vadd.f32 %v4963_v55, %v4915_v21  ;;  %v5079_v57 = vpop.permute.xlu0 %2294  ;;  %v5615_v12 = vld [vmem:[#allocation10_spill] sm:$0xff] }
 0x155   : > { %v2711_v40 = vrot.slane %v2710_v49, 4  ;;  %v5075_v62 = vadd.f32 %v4963_v55, %v4921_v23  ;;  %v1459_v63 = vadd.f32 %v4963_v55, %v4927_v7  ;;  %v2524_v30 = vmul.f32 %v5615_v12, %v1834_v22  ;;  %v5086_v26 = vpop.f32.mrf.mxu1  ;;  %v5089_v43 = vpop.f32.mrf.mxu0  ;;  %v5618_v12 = vld [vmem:[#allocation15_spill] sm:$0xff] }
 0x156   : > { %v2722_v54 = vsel %vm2611_vm1, %v2526_v14, -inf  ;;  %v1898_v29 = vmax.f32 %v1702_v53, 0.0  ;;  %v5084_v15 = vsel %vm2611_vm1, %v2587_v37, -inf  ;;  %v1839_v33 = vmax.f32 %v1467_v48, 0.0  ;;  %v5617_v48 = vld [vmem:[#allocation17_spill] sm:$0xff] }
 0x157   : > { %5614 = vst [vmem:[#allocation8_spill] sm:$0xff] %v5075_v62  ;;  %v2712_v21 = vmax.f32 %v2710_v49, %v2711_v40  ;;  %v1837_v17 = vmax.f32 %v1459_v63, 0.0  ;;  %v2718_v7 = vsel %vm2611_vm1, %v2524_v30, -inf  ;;  %v5095_v14 = vadd.f32 %v4963_v55, %v4936_v9 }
 0x158   : > { %v2588_v19 = vmul.f32 %v4908_v2, %v1898_v29  ;;  %v5616_v22 = vmax.f32 %v4811_v60, 0.0  ;;  %v5100_v37 = vpop.permute.xlu1 %2329  ;;  %v2719_v40 = vmax.f32 %v2717_v39, %v2718_v7  ;;  %v2529_v63 = vmul.f32 %v5617_v48, %v1839_v33  ;;  %v5104_v51 = vpop.permute.xlu0 %2426 }
 0x159   : > { %v2713_v49 = vrot.slane %v2712_v21, 2  ;;  %v2527_v23 = vmul.f32 %v5618_v12, %v1837_v17  ;;  %v5619_v60 = vmax.f32 %v4630_v61, 0.0  ;;  %v1733_v29 = vpop.f32.mrf.mxu1  ;;  %v5114_v17 = vpop.f32.mrf.mxu0  ;;  %v1470_v61 = vadd.f32 %v4963_v55, %v4943_v46 }
 0x15a   : > { %v2581_v53 = vmul.f32 %v4938_v59, %v5616_v22  ;;  %v2886_v2 = vsel %vm2611_vm1, %v2588_v19, -inf  ;;  %v2721_v62 = vmax.f32 %v2719_v40, %v2720_v42  ;;  %v2728_v33 = vsel %vm2611_vm1, %v2529_v63, -inf }
 0x15b   : > { %v2566_v59 = vmul.f32 %v4941_v32, %v5619_v60  ;;  %v2714_v22 = vmax.f32 %v2712_v21, %v2713_v49  ;;  %v2887_v39 = vmax.f32 %v5084_v15, %v2886_v2  ;;  %v2724_v7 = vsel %vm2611_vm1, %v2527_v23, -inf  ;;  %v5149_v2 = vpop.f32.mrf.mxu0 }
 0x15c   : > { %v2867_v9 = vsel %vm2611_vm1, %v2581_v53, -inf  ;;  %v5124_v32 = vpop.permute.xlu1 %2461  ;;  %v2723_v42 = vmax.f32 %v2721_v62, %v2722_v54  ;;  %v5130_v53 = vadd.f32 %v4963_v55, %v4953_v6  ;;  %v5132_v23 = vpop.permute.xlu0 %2395  ;;  %v1462_v49 = vadd.f32 %v4963_v55, %v4957_v44  ;;  %v5622_v44 = vld [vmem:[#allocation16_spill] sm:$0xff] }
 0x15d   : > { %v5117_v19 = vmax.f32 %v2866_v28, %v2867_v9  ;;  %v5120_v48 = vsel %vm2611_vm1, %v2566_v59, -inf  ;;  %v2715_v21 = vrot.slane %v2714_v22, 1  ;;  %v1840_v28 = vmax.f32 %v1470_v61, 0.0  ;;  %v3682_v54 = vpop.f32.mrf.mxu1 }
 0x15e   : > { %5620 = vst [vmem:[#allocation6_spill] sm:$0xff] %v5130_v53  ;;  %v5138_v46 = vadd.f32 %v4963_v55, %v4989_v11  ;;  %v1483_v62 = vadd.f32 %v4963_v55, %v4983_v41  ;;  %v2725_v63 = vmax.f32 %v2723_v42, %v2724_v7  ;;  %v5147_v12 = vadd.f32 %v4963_v55, %v5029_v13 }
 0x15f   : > { %v5142_v40 = vmax.f32 %v2714_v22, %v2715_v21  ;;  %v2530_v9 = vmul.f32 %v5622_v44, %v1840_v28  ;;  %v1838_v60 = vmax.f32 %v1462_v49, 0.0  ;;  %v1475_v22 = vadd.f32 %v4963_v55, %v5001_v56  ;;  %v5624_v49 = vld [vmem:[#allocation14_spill] sm:$0xff]  ;;  %v5625_v44 = vld [vmem:[#allocation21_spill] sm:$0xff]  ;;  %v1746_v56 = vpop.f32.mrf.mxu1 }
 0x160   : > { %v1843_v59 = vmax.f32 %v1483_v62, 0.0  ;;  %v5153_v61 = vpop.permute.xlu1 %2364  ;;  %v1731_v7 = vadd.f32 %v4963_v55, %v5057_v3  ;;  %v5623_v13 = vmax.f32 %v5010_v47, 0.0  ;;  %v5163_v42 = vpop.permute.xlu0 %2298  ;;  %v5626_v11 = vmax.f32 %v4720_v8, 0.0 }
 0x161   : > { %5621 = vst [vmem:[#allocation13_spill] sm:$0xff] %v5142_v40  ;;  %v2730_v28 = vsel %vm2611_vm1, %v2530_v9, -inf  ;;  %v2528_v62 = vmul.f32 %v5624_v49, %v1838_v60  ;;  %v1841_v41 = vmax.f32 %v1475_v22, 0.0  ;;  %v1486_v47 = vadd.f32 %v4963_v55, %v5032_v36  ;;  %v5629_v36 = vld [vmem:[#allocation18_spill] sm:$0xff] }
 0x162   : > { %v2589_v21 = vmul.f32 %v5012_v16, %v5623_v13  ;;  %v2533_v6 = vmul.f32 %v5625_v44, %v1843_v59  ;;  %v2574_v30 = vmul.f32 %v5019_v10, %v5626_v11  ;;  %v1905_v15 = vmax.f32 %v1731_v7, 0.0  ;;  %v5174_v16 = vpop.f32.mrf.mxu0  ;;  %v5627_v59 = vld [vmem:[#allocation19_spill] sm:$0xff] }
 0x163   : > { %v2726_v9 = vsel %vm2611_vm1, %v2528_v62, -inf  ;;  %v2531_v22 = vmul.f32 %v5627_v59, %v1841_v41  ;;  %v1844_v49 = vmax.f32 %v1486_v47, 0.0 }
 0x164   : > { %v2888_v3 = vsel %vm2611_vm1, %v2589_v21, -inf  ;;  %v2741_v60 = vsel %vm2611_vm1, %v2533_v6, -inf  ;;  %v5181_v8 = vsel %vm2611_vm1, %v2574_v30, -inf  ;;  %v5183_v10 = vpop.permute.xlu1 %2333  ;;  %v2727_v11 = vmax.f32 %v2725_v63, %v2726_v9  ;;  %v5189_v21 = vpop.permute.xlu0 %2430 }
 0x165   : > { %v5178_v13 = vmax.f32 %v2887_v39, %v2888_v3  ;;  %v2595_v7 = vmul.f32 %v4981_v18, %v1905_v15  ;;  %v5193_v39 = vadd.f32 %v4963_v55, %v5086_v26  ;;  %v1478_v30 = vadd.f32 %v4963_v55, %v5063_v35  ;;  %v3683_v63 = vpop.f32.mrf.mxu1  ;;  %v5204_v44 = vpop.f32.mrf.mxu0  ;;  %v5628_v3 = vld [vmem:[#allocation20_spill] sm:$0xff] }
 0x166   : > { %v1734_v6 = vadd.f32 %v4963_v55, %v1733_v29  ;;  %v2729_v62 = vmax.f32 %v2727_v11, %v2728_v33  ;;  %v2738_v41 = vsel %vm2611_vm1, %v2531_v22, -inf  ;;  %v1499_v15 = vadd.f32 %v4963_v55, %v5089_v43 }
 0x167   : > { %v5200_v18 = vsel %vm2611_vm1, %v2595_v7, -inf  ;;  %v2534_v26 = vmul.f32 %v5628_v3, %v1844_v49  ;;  %v1842_v9 = vmax.f32 %v1478_v30, 0.0  ;;  %v5211_v11 = vadd.f32 %v4963_v55, %v3682_v54  ;;  %v1506_v53 = vpop.f32.mrf.mxu0 }
 0x168   : > { %v1906_v35 = vmax.f32 %v1734_v6, 0.0  ;;  %v5208_v59 = vpop.permute.xlu1 %2465  ;;  %v2731_v29 = vmax.f32 %v2729_v62, %v2730_v28  ;;  %v1847_v33 = vmax.f32 %v1499_v15, 0.0  ;;  %v1491_v22 = vadd.f32 %v4963_v55, %v5114_v17  ;;  %v5215_v7 = vpop.permute.xlu0 %2399  ;;  %v5630_v62 = vld [vmem:[#allocation25_spill] sm:$0xff] }
 0x169   : > { %v2743_v43 = vsel %vm2611_vm1, %v2534_v26, -inf  ;;  %v2532_v49 = vmul.f32 %v5629_v36, %v1842_v9  ;;  %v5221_v30 = vadd.f32 %v4963_v55, %v1746_v56  ;;  %v1749_v6 = vpop.f32.mrf.mxu1  ;;  %v5631_v36 = vmax.f32 %v4864_v1, 0.0 }
 0x16a   : > { %v2596_v3 = vmul.f32 %v4973_v24, %v1906_v35  ;;  %v2732_v28 = vrot.slane %v2731_v29, 4  ;;  %v2537_v15 = vmul.f32 %v5630_v62, %v1847_v33  ;;  %v1845_v47 = vmax.f32 %v1491_v22, 0.0  ;;  %v5632_v62 = vld [vmem:[#allocation23_spill] sm:$0xff] }
 0x16b   : > { %v2739_v17 = vsel %vm2611_vm1, %v2532_v49, -inf  ;;  %v2582_v24 = vmul.f32 %v5069_v50, %v5631_v36  ;;  %v1502_v1 = vadd.f32 %v4963_v55, %v5149_v2  ;;  %v5246_v50 = vadd.f32 %v4963_v55, %v3683_v63 }
 0x16c   : > { %v2907_v40 = vsel %vm2611_vm1, %v2596_v3, -inf  ;;  %v5231_v56 = vpop.permute.xlu1 %2368  ;;  %v2733_v9 = vmax.f32 %v2731_v29, %v2732_v28  ;;  %v2740_v35 = vmax.f32 %v2738_v41, %v2739_v17  ;;  %v2749_v33 = vsel %vm2611_vm1, %v2537_v15, -inf  ;;  %v5235_v22 = vpop.permute.xlu0 %2302 }
 0x16d   : > { %v2535_v54 = vmul.f32 %v5632_v62, %v1845_v47  ;;  %v5238_v49 = vsel %vm2611_vm1, %v2582_v24, -inf  ;;  %v5633_v3 = vmax.f32 %v4661_v25, 0.0  ;;  %v3686_v41 = vpop.f32.mrf.mxu1  ;;  %v3623_v17 = vpop.f32.mrf.mxu0  ;;  %v1848_v25 = vmax.f32 %v1502_v1, 0.0 }
 0x16e   : > { %v2734_v29 = vrot.slane %v2733_v9, 2  ;;  %v2742_v28 = vmax.f32 %v2740_v35, %v2741_v60  ;;  %v1494_v2 = vadd.f32 %v4963_v55, %v5174_v16  ;;  %v5634_v60 = vmax.f32 %v5026_v20, %v5120_v48 }
 0x16f   : > { %v2567_v26 = vmul.f32 %v5079_v57, %v5633_v3  ;;  %v2745_v47 = vsel %vm2611_vm1, %v2535_v54, -inf  ;;  %v5263_v35 = vadd.f32 %v4963_v55, %v1749_v6  ;;  %v5635_v3 = vld [vmem:[#allocation24_spill] sm:$0xff]  ;;  %v5636_v57 = vmax.f32 %v4752_v34, 0.0 }
 0x170   : > { %v5255_v24 = vpop.permute.xlu1 %2337  ;;  %v2735_v63 = vmax.f32 %v2733_v9, %v2734_v29  ;;  %v2744_v62 = vmax.f32 %v2742_v28, %v2743_v43  ;;  %v1846_v1 = vmax.f32 %v1494_v2, 0.0  ;;  %v5637_v16 = vmax.f32 %v5147_v12, 0.0  ;;  %v1762_v43 = vpop.f32.mrf.mxu1  ;;  %v5638_v2 = vld [vmem:[#allocation22_spill] sm:$0xff] }
 0x171   : > { %v2829_v36 = vsel %vm2611_vm1, %v2567_v26, -inf  ;;  %v2538_v26 = vmul.f32 %v5635_v3, %v1848_v25  ;;  %v2575_v15 = vmul.f32 %v5100_v37, %v5636_v57  ;;  %v5272_v29 = vpop.permute.xlu0 %2434  ;;  %v1910_v28 = vmax.f32 %v5263_v35, 0.0 }
 0x172   : > { %v5260_v54 = vmax.f32 %v5634_v60, %v2829_v36  ;;  %v2597_v9 = vmul.f32 %v5104_v51, %v5637_v16  ;;  %v2736_v20 = vrot.slane %v2735_v63, 1  ;;  %v2746_v48 = vmax.f32 %v2744_v62, %v2745_v47  ;;  %v1509_v36 = vpop.f32.mrf.mxu0 }
 0x173   : > { %v2908_v6 = vmax.f32 %v5200_v18, %v2907_v40  ;;  %v2751_v25 = vsel %vm2611_vm1, %v2538_v26, -inf  ;;  %v2536_v34 = vmul.f32 %v5638_v2, %v1846_v1  ;;  %v2850_v37 = vsel %vm2611_vm1, %v2575_v15, -inf }
 0x174   : > { %v2909_v12 = vsel %vm2611_vm1, %v2597_v9, -inf  ;;  %v5280_v57 = vmax.f32 %v2735_v63, %v2736_v20  ;;  %v5639_v51 = vmax.f32 %v5060_v0, %v5181_v8  ;;  %v1515_v40 = vadd.f32 %v4963_v55, %v5204_v44  ;;  %v3687_v63 = vpop.f32.mrf.mxu1  ;;  %v5295_v26 = vpop.permute.xlu1 %2469 }
 0x175   : > { %v5287_v47 = vmax.f32 %v2908_v6, %v2909_v12  ;;  %v2747_v18 = vsel %vm2611_vm1, %v2536_v34, -inf  ;;  %v1771_v62 = vadd.f32 %v4963_v55, %v3686_v41  ;;  %v1507_v15 = vadd.f32 %v4963_v55, %v1506_v53  ;;  %v3626_v44 = vpop.f32.mrf.mxu0  ;;  %v5304_v53 = vpop.permute.xlu0 %2403  ;;  %v5641_v34 = vld [vmem:[#allocation29_spill] sm:$0xff]  ;;  %v5642_v12 = vld [vmem:[#allocation27_spill] sm:$0xff] }
 0x176   : > { %v5285_v60 = vmax.f32 %v5639_v51, %v2850_v37  ;;  %v1763_v3 = vadd.f32 %v4963_v55, %v1762_v43  ;;  %v2748_v1 = vmax.f32 %v2746_v48, %v2747_v18  ;;  %v1851_v0 = vmax.f32 %v1515_v40, 0.0  ;;  %v1765_v18 = vpop.f32.mrf.mxu1 }
 0x177   : > { %v5640_v8 = vmax.f32 %v5044_v4, 0.0  ;;  %v1518_v9 = vadd.f32 %v4963_v55, %v3623_v17  ;;  %v1915_v20 = vmax.f32 %v1771_v62, 0.0  ;;  %v1849_v6 = vmax.f32 %v1507_v15, 0.0 }
 0x178   : > { %v1913_v2 = vmax.f32 %v1763_v3, 0.0  ;;  %v5302_v41 = vadd.f32 %v4963_v55, %v3687_v63  ;;  %v2750_v43 = vmax.f32 %v2748_v1, %v2749_v33  ;;  %v2541_v37 = vmul.f32 %v5641_v34, %v1851_v0  ;;  %v5643_v33 = vld [vmem:[#allocation28_spill] sm:$0xff]  ;;  %v1522_v1 = vpop.f32.mrf.mxu0 }
 0x179   : > { %v2590_v16 = vmul.f32 %v5132_v23, %v5640_v8  ;;  %v1852_v4 = vmax.f32 %v1518_v9, 0.0  ;;  %v2539_v23 = vmul.f32 %v5642_v12, %v1849_v6  ;;  %v2605_v51 = vmul.f32 %v5124_v32, %v1915_v20 }
 0x17a   : > { %v2603_v17 = vmul.f32 %v5052_v45, %v1913_v2  ;;  %v2752_v62 = vmax.f32 %v2750_v43, %v2751_v25  ;;  %v2762_v15 = vsel %vm2611_vm1, %v2541_v37, -inf  ;;  %v1916_v63 = vmax.f32 %v5302_v41, 0.0 }
 0x17b   : > { %v5308_v48 = vsel %vm2611_vm1, %v2590_v16, -inf  ;;  %v2542_v3 = vmul.f32 %v5643_v33, %v1852_v4  ;;  %v2759_v0 = vsel %vm2611_vm1, %v2539_v23, -inf  ;;  %v2930_v45 = vsel %vm2611_vm1, %v2605_v51, -inf  ;;  %v5322_v16 = vpop.permute.xlu1 %2372  ;;  %v5334_v4 = vpop.permute.xlu0 %2306 }
 0x17c   : > { %v2891_v40 = vmax.f32 %v5178_v13, %v5308_v48  ;;  %v2927_v8 = vsel %vm2611_vm1, %v2603_v17, -inf  ;;  %v1510_v32 = vadd.f32 %v4963_v55, %v1509_v36  ;;  %v2753_v9 = vrot.slane %v2752_v62, 4 }
 0x17d   : > { %v2764_v25 = vsel %vm2611_vm1, %v2542_v3, -inf  ;;  %v1766_v20 = vadd.f32 %v4963_v55, %v1765_v18  ;;  %v5644_v6 = vmax.f32 %v4925_v27, 0.0  ;;  %v5645_v43 = vmax.f32 %v4686_v31, 0.0  ;;  %v5647_v18 = vld [vmem:[#allocation26_spill] sm:$0xff] }
 0x17e   : > { %v1850_v41 = vmax.f32 %v1510_v32, 0.0  ;;  %v1531_v37 = vadd.f32 %v4963_v55, %v3626_v44  ;;  %v1523_v36 = vadd.f32 %v4963_v55, %v1522_v1  ;;  %v2754_v12 = vmax.f32 %v2752_v62, %v2753_v9 }
 0x17f   : > { %v2583_v2 = vmul.f32 %v5153_v61, %v5644_v6  ;;  %v2568_v34 = vmul.f32 %v5163_v42, %v5645_v43  ;;  %v1914_v23 = vmax.f32 %v1766_v20, 0.0  ;;  %v5646_v51 = vmax.f32 %v4788_v58, 0.0  ;;  %v3627_v61 = vpop.f32.mrf.mxu0 }
 0x180   : > { %v2540_v33 = vmul.f32 %v5647_v18, %v1850_v41  ;;  %v5648_v31 = vmax.f32 %v5117_v19, %v5238_v49  ;;  %v1855_v3 = vmax.f32 %v1531_v37, 0.0  ;;  %v2755_v1 = vrot.slane %v2754_v12, 2  ;;  %v5355_v49 = vpop.permute.xlu1 %2341  ;;  %v3690_v18 = vpop.f32.mrf.mxu1 }
 0x181   : > { %v2871_v17 = vsel %vm2611_vm1, %v2583_v2, -inf  ;;  %v2576_v27 = vmul.f32 %v5183_v10, %v5646_v51  ;;  %v2831_v44 = vsel %vm2611_vm1, %v2568_v34, -inf  ;;  %v2604_v62 = vmul.f32 %v5046_v5, %v1914_v23  ;;  %v5649_v10 = vld [vmem:[#allocation33_spill] sm:$0xff]  ;;  %v5651_v5 = vld [vmem:[#allocation31_spill] sm:$0xff] }
 0x182   : > { %v5344_v42 = vmax.f32 %v5648_v31, %v2871_v17  ;;  %v2832_v32 = vmax.f32 %v5260_v54, %v2831_v44  ;;  %v1853_v9 = vmax.f32 %v1523_v36, 0.0  ;;  %v2760_v58 = vsel %vm2611_vm1, %v2540_v33, -inf  ;;  %v1525_v54 = vpop.f32.mrf.mxu0 }
 0x183   : > { %v2545_v20 = vmul.f32 %v5649_v10, %v1855_v3  ;;  %v2852_v6 = vsel %vm2611_vm1, %v2576_v27, -inf  ;;  %v5650_v2 = vmax.f32 %v5193_v39, 0.0  ;;  %v2756_v41 = vmax.f32 %v2754_v12, %v2755_v1  ;;  %v5362_v39 = vpop.permute.xlu0 %2438  ;;  %v5654_v10 = vld [vmem:[#allocation34_spill] sm:$0xff] }
 0x184   : > { %v2761_v43 = vmax.f32 %v2759_v0, %v2760_v58  ;;  %v2928_v34 = vsel %vm2611_vm1, %v2604_v62, -inf  ;;  %v2543_v37 = vmul.f32 %v5651_v5, %v1853_v9  ;;  %v2853_v17 = vmax.f32 %v5285_v60, %v2852_v6  ;;  %v1778_v6 = vpop.f32.mrf.mxu1 }
 0x185   : > { %v2598_v19 = vmul.f32 %v5189_v21, %v5650_v2  ;;  %v2929_v36 = vmax.f32 %v2927_v8, %v2928_v34  ;;  %v2770_v23 = vsel %vm2611_vm1, %v2545_v20, -inf  ;;  %v2757_v21 = vrot.slane %v2756_v41, 1 }
 0x186   : > { %v2763_v27 = vmax.f32 %v2761_v43, %v2762_v15  ;;  %v2766_v12 = vsel %vm2611_vm1, %v2543_v37, -inf  ;;  %v1534_v33 = vadd.f32 %v4963_v55, %v3627_v61  ;;  %v1526_v8 = vadd.f32 %v4963_v55, %v1525_v54  ;;  %v5658_v37 = vld [vmem:[#allocation36_spill] sm:$0xff] }
 0x187   : > { %v2911_v51 = vsel %vm2611_vm1, %v2598_v19, -inf  ;;  %v2606_v31 = vmul.f32 %v5208_v59, %v1916_v63  ;;  %v2931_v44 = vmax.f32 %v2929_v36, %v2930_v45  ;;  %v5369_v60 = vmax.f32 %v2756_v41, %v2757_v21  ;;  %v5381_v63 = vpop.permute.xlu1 %2473  ;;  %v2408_v43 = vpop.permute.xlu0 %2407 }
 0x188   : > { %v2912_v0 = vmax.f32 %v5287_v47, %v2911_v51  ;;  %v2765_v3 = vmax.f32 %v2763_v27, %v2764_v25  ;;  %v5652_v1 = vmax.f32 %v5095_v14, 0.0  ;;  %v5653_v15 = vmax.f32 %v4979_v38, 0.0  ;;  %v5656_v38 = vld [vmem:[#allocation32_spill] sm:$0xff] }
 0x189   : > { %v1856_v47 = vmax.f32 %v1534_v33, 0.0  ;;  %v1854_v58 = vmax.f32 %v1526_v8, 0.0  ;;  %v2932_v61 = vsel %vm2611_vm1, %v2606_v31, -inf  ;;  %v5655_v20 = vmax.f32 %v5654_v10, 0.0  ;;  %v3691_v8 = vpop.f32.mrf.mxu1  ;;  %v5667_v10 = vld [vmem:[#allocation37_spill] sm:$0xff] }
 0x18a   : > { %v2591_v62 = vmul.f32 %v5215_v7, %v5652_v1  ;;  %v2584_v9 = vmul.f32 %v5231_v56, %v5653_v15  ;;  %v2767_v45 = vmax.f32 %v2765_v3, %v2766_v12  ;;  %v2933_v25 = vmax.f32 %v2931_v44, %v2932_v61  ;;  %v5657_v56 = vld [vmem:[#allocation30_spill] sm:$0xff]  ;;  %v5666_v61 = vld [vmem:[#allocation39_spill] sm:$0xff] }
 0x18b   : > { %v2569_v59 = vmul.f32 %v5235_v22, %v5655_v20  ;;  %v2546_v2 = vmul.f32 %v5656_v38, %v1856_v47  ;;  %v2544_v19 = vmul.f32 %v5657_v56, %v1854_v58  ;;  %v5395_v5 = vadd.f32 %v4963_v55, %v3690_v18  ;;  %v2443_v3 = vpop.permute.xlu1 %2442  ;;  %v5668_v56 = vld [vmem:[#allocation38_spill] sm:$0xff] }
 0x18c   : > { %v2892_v14 = vsel %vm2611_vm1, %v2591_v62, -inf  ;;  %v2873_v7 = vsel %vm2611_vm1, %v2584_v9, -inf  ;;  %v5659_v54 = vmax.f32 %v5658_v37, 0.0  ;;  %v5660_v51 = vmax.f32 %v5221_v30, 0.0  ;;  %v5664_v9 = vld [vmem:[#allocation35_spill] sm:$0xff] }
 0x18d   : > { %v5390_v41 = vmax.f32 %v2891_v40, %v2892_v14  ;;  %v2874_v22 = vmax.f32 %v5344_v42, %v2873_v7  ;;  %v2833_v34 = vsel %vm2611_vm1, %v2569_v59, -inf  ;;  %v2772_v13 = vsel %vm2611_vm1, %v2546_v2, -inf }
 0x18e   : > { %v2577_v36 = vmul.f32 %v5255_v24, %v5659_v54  ;;  %v2599_v21 = vmul.f32 %v5272_v29, %v5660_v51  ;;  %v2768_v48 = vsel %vm2611_vm1, %v2544_v19, -inf  ;;  %v2834_v40 = vmax.f32 %v2832_v32, %v2833_v34  ;;  %v5662_v32 = vld [vmem:[#allocation5_spill] sm:$0xff] }
 0x18f   : > { %v1779_v42 = vadd.f32 %v4963_v55, %v1778_v6  ;;  %v2769_v27 = vmax.f32 %v2767_v45, %v2768_v48  ;;  %v1919_v12 = vmax.f32 %v5395_v5, 0.0  ;;  %v5661_v29 = vmax.f32 %v5138_v46, 0.0 }
 0x190   : > { %v2854_v18 = vsel %vm2611_vm1, %v2577_v36, -inf  ;;  %v2913_v33 = vsel %vm2611_vm1, %v2599_v21, -inf  ;;  %v5663_v62 = vmax.f32 %v5662_v32, 0.0  ;;  %v5665_v47 = vmax.f32 %v5664_v9, 0.0  ;;  %v5670_v36 = vld [vmem:[#allocation8_spill] sm:$0xff]  ;;  %v2478_v21 = vpop.permute.xlu1 %2477 }
 0x191   : > { %v2855_v24 = vmax.f32 %v2853_v17, %v2854_v18  ;;  %v2914_v31 = vmax.f32 %v2912_v0, %v2913_v33  ;;  %v1917_v30 = vmax.f32 %v1779_v42, 0.0  ;;  %v2592_v44 = vmul.f32 %v5304_v53, %v5661_v29 }
 0x192   : > { %v2771_v1 = vmax.f32 %v2769_v27, %v2770_v23  ;;  %v2585_v15 = vmul.f32 %v5322_v16, %v5663_v62  ;;  %v2570_v58 = vmul.f32 %v5334_v4, %v5665_v47  ;;  %v2967_v17 = vsel %vm2966_vm3, %v5667_v10, %v5666_v61  ;;  %v2377_v23 = vpop.permute.xlu0 %2376  ;;  %v1781_v4 = vpop.f32.mrf.mxu1 }
 0x193   : > { %v2607_v0 = vmul.f32 %v5295_v26, %v1917_v30  ;;  %v2894_v46 = vsel %vm2611_vm1, %v2592_v44, -inf  ;;  %v1790_v53 = vadd.f32 %v4963_v55, %v3691_v8  ;;  %v5669_v19 = vmax.f32 %v5668_v56, 0.0  ;;  %v5673_v44 = vld [vmem:[#allocation9_spill] sm:$0xff] }
 0x194   : > { %v2773_v20 = vmax.f32 %v2771_v1, %v2772_v13  ;;  %v2895_v59 = vmax.f32 %v5390_v41, %v2894_v46  ;;  %v2875_v16 = vsel %vm2611_vm1, %v2585_v15, -inf  ;;  %v2835_v45 = vsel %vm2611_vm1, %v2570_v58, -inf  ;;  %v5675_v1 = vld [vmem:[#allocation13_spill] sm:$0xff]  ;;  %v2482_v47 = vpop.permute.xlu1 %2481 }
 0x195   : > { %v2934_v14 = vsel %vm2611_vm1, %v2607_v0, -inf  ;;  %v2876_v7 = vmax.f32 %v2874_v22, %v2875_v16  ;;  %v2836_v6 = vmax.f32 %v2834_v40, %v2835_v45  ;;  %v1920_v38 = vmax.f32 %v1790_v53, 0.0 }
 0x196   : > { %v2774_v26 = vrot.slane %v2773_v20, 4  ;;  %v2935_v2 = vmax.f32 %v2933_v25, %v2934_v14  ;;  %v2578_v34 = vmul.f32 %v5355_v49, %v5669_v19  ;;  %v2969_v5 = vsel %vm2968_vm4, %v4975_v52, %v2967_v17  ;;  %v2412_v27 = vpop.permute.xlu0 %2411 }
 0x197   : > { %v2837_v41 = vrot.slane %v2836_v6, 4  ;;  %v2600_v37 = vmul.f32 %v5362_v39, %v1910_v28  ;;  %v1782_v54 = vadd.f32 %v4963_v55, %v1781_v4  ;;  %v5671_v22 = vmax.f32 %v5670_v36, 0.0 }
 0x198   : > { %v2775_v13 = vmax.f32 %v2773_v20, %v2774_v26  ;;  %v2856_v25 = vsel %vm2611_vm1, %v2578_v34, -inf  ;;  %v5672_v48 = vmax.f32 %v5211_v11, 0.0  ;;  %v2971_v32 = vsel %vm2970_vm5, %v5675_v1, %v2969_v5  ;;  %v5679_v34 = vld [vmem:[#allocation7_spill] sm:$0xff] }
 0x199   : > { %v2593_v51 = vmul.f32 %v2408_v43, %v5671_v22  ;;  %v2838_v40 = vmax.f32 %v2836_v6, %v2837_v41  ;;  %v2857_v52 = vmax.f32 %v2855_v24, %v2856_v25  ;;  %v2915_v42 = vsel %vm2611_vm1, %v2600_v37, -inf }
 0x19a   : > { %v2601_v49 = vmul.f32 %v2443_v3, %v5672_v48  ;;  %v1918_v35 = vmax.f32 %v1782_v54, 0.0  ;;  %v2776_v28 = vrot.slane %v2775_v13, 2  ;;  %v2916_v39 = vmax.f32 %v2914_v31, %v2915_v42  ;;  %v2447_v53 = vpop.permute.xlu0 %2446 }
 0x19b   : > { %v2896_v55 = vsel %vm2611_vm1, %v2593_v51, -inf  ;;  %v2839_v18 = vrot.slane %v2838_v40, 2  ;;  %v2858_v33 = vrot.slane %v2857_v52, 4  ;;  %v5674_v24 = vmax.f32 %v5673_v44, 0.0 }
 0x19c   : > { %v2917_v43 = vsel %vm2611_vm1, %v2601_v49, -inf  ;;  %v2608_v8 = vmul.f32 %v5381_v63, %v1918_v35  ;;  %v2897_v11 = vmax.f32 %v2895_v59, %v2896_v55  ;;  %v2777_v30 = vmax.f32 %v2775_v13, %v2776_v28  ;;  %v5676_v59 = vld [vmem:[#allocation6_spill] sm:$0xff] }
 0x19d   : > { %v2918_v29 = vmax.f32 %v2916_v39, %v2917_v43  ;;  %v2586_v3 = vmul.f32 %v2377_v23, %v5674_v24  ;;  %v2840_v62 = vmax.f32 %v2838_v40, %v2839_v18  ;;  %v2859_v31 = vmax.f32 %v2857_v52, %v2858_v33 }
 0x19e   : > { %v2936_v15 = vsel %vm2611_vm1, %v2608_v8, -inf  ;;  %v2609_v9 = vmul.f32 %v2478_v21, %v1919_v12  ;;  %v2778_v58 = vrot.slane %v2777_v30, 1  ;;  %v5677_v16 = vmax.f32 %v5676_v59, 0.0 }
 0x19f   : > { %v2937_v61 = vmax.f32 %v2935_v2, %v2936_v15  ;;  %v2877_v10 = vsel %vm2611_vm1, %v2586_v3, -inf  ;;  %v2841_v63 = vrot.slane %v2840_v62, 1  ;;  %v2860_v17 = vrot.slane %v2859_v31, 2 }
 0x1a0   : > { %v2878_v0 = vmax.f32 %v2876_v7, %v2877_v10  ;;  %v2938_v46 = vsel %vm2611_vm1, %v2609_v9, -inf  ;;  %v2779_v23 = vmax.f32 %v2777_v30, %v2778_v58  ;;  %v2594_v45 = vmul.f32 %v2412_v27, %v5677_v16 }
 0x1a1   : > { %v2939_v20 = vmax.f32 %v2937_v61, %v2938_v46  ;;  %v2610_v12 = vmul.f32 %v2482_v47, %v1920_v38  ;;  %v2842_v4 = vmax.f32 %v2840_v62, %v2841_v63  ;;  %v2861_v14 = vmax.f32 %v2859_v31, %v2860_v17 }
 0x1a2   : > { %v2879_v6 = vrot.slane %v2878_v0, 4  ;;  %v2898_v26 = vsel %vm2611_vm1, %v2594_v45, -inf  ;;  %v5678_v7 = vmax.f32 %v5246_v50, 0.0  ;;  %v2973_v19 = vsel %vm2972_vm6, %v5280_v57, %v2971_v32 }
 0x1a3   : > { %v2940_v2 = vsel %vm2611_vm1, %v2610_v12, -inf  ;;  %v2979_v5 = vsel %vm2966_vm3, %v2842_v4, %v5679_v34  ;;  %v2862_v38 = vrot.slane %v2861_v14, 1  ;;  %v2899_v37 = vmax.f32 %v2897_v11, %v2898_v26 }
 0x1a4   : > { %v2602_v56 = vmul.f32 %v2447_v53, %v5678_v7  ;;  %v2880_v41 = vmax.f32 %v2878_v0, %v2879_v6  ;;  %v2941_v54 = vmax.f32 %v2939_v20, %v2940_v2  ;;  %v2975_v22 = vsel %vm2974_vm7, %v5369_v60, %v2973_v19 }
 0x1a5   : > { %v2863_v51 = vmax.f32 %v2861_v14, %v2862_v38  ;;  %v2900_v50 = vrot.slane %v2899_v37, 4  ;;  %v2977_v57 = vsel %vm2976_vm8, %v2779_v23, %v2975_v22 }
 0x1a6   : > { %v2919_v36 = vsel %vm2611_vm1, %v2602_v56, -inf  ;;  %v2881_v21 = vrot.slane %v2880_v41, 2  ;;  %v2942_v25 = vrot.slane %v2941_v54, 4  ;;  %2987 = vst.msk [vmem:[%s252_s12] sm:$0xff] %vm2611_vm1, %v2977_v57 }
 0x1a7   : > { %v2920_v13 = vmax.f32 %v2918_v29, %v2919_v36  ;;  %v2980_v48 = vsel %vm2968_vm4, %v2863_v51, %v2979_v5  ;;  %v2901_v40 = vmax.f32 %v2899_v37, %v2900_v50 }
 0x1a8   : > { %v2882_v49 = vmax.f32 %v2880_v41, %v2881_v21  ;;  %v2943_v42 = vmax.f32 %v2941_v54, %v2942_v25 }
 0x1a9   : > { %v2921_v52 = vrot.slane %v2920_v13, 4  ;;  %v2902_v60 = vrot.slane %v2901_v40, 2 }
 0x1aa   : > { %v2883_v35 = vrot.slane %v2882_v49, 1  ;;  %v2944_v28 = vrot.slane %v2943_v42, 2 }
 0x1ab   : > { %v2922_v27 = vmax.f32 %v2920_v13, %v2921_v52  ;;  %v2903_v55 = vmax.f32 %v2901_v40, %v2902_v60 }
 0x1ac   : > { %v2884_v39 = vmax.f32 %v2882_v49, %v2883_v35  ;;  %v2945_v18 = vmax.f32 %v2943_v42, %v2944_v28 }
 0x1ad   : > { %v2923_v43 = vrot.slane %v2922_v27, 2  ;;  %v2904_v8 = vrot.slane %v2903_v55, 1 }
 0x1ae   : > { %v2981_v33 = vsel %vm2970_vm5, %v2884_v39, %v2980_v48  ;;  %v2946_v30 = vrot.slane %v2945_v18, 1 }
 0x1af   : > { %v2924_v11 = vmax.f32 %v2922_v27, %v2923_v43  ;;  %v2905_v29 = vmax.f32 %v2903_v55, %v2904_v8 }
 0x1b0   : > { %v2947_v24 = vmax.f32 %v2945_v18, %v2946_v30 }
 0x1b1   : > { %v2925_v44 = vrot.slane %v2924_v11, 1  ;;  %v2982_v1 = vsel %vm2972_vm6, %v2905_v29, %v2981_v33 }
 0x1b3   : > { %v2926_v3 = vmax.f32 %v2924_v11, %v2925_v44 }
 0x1b5   : > { %v2983_v32 = vsel %vm2974_vm7, %v2926_v3, %v2982_v1 }
 0x1b6   : > { %v2984_v62 = vsel %vm2976_vm8, %v2947_v24, %v2983_v32 }
 0x1b7   : > { %2988 = vst.msk [vmem:[%s252_s12 + $0x8] sm:$0xff] %vm2611_vm1, %v2984_v62 }
 0x1b8   : > { %3757 = shalt.err (!%p3754_p4)
}
 0x1b9   : > { %s3758_s6 = scalar_lea.hbm %s5478_s17, 256  ;;  %s3762_s9 = scalar_lea.hbm %s5532_s5, 512 }
 0x1ba   : > { %p3759_p7 = scmp.ne.s32.totalorder %s5478_s17, %s3758_s6  ;;  %p3763_p10 = scmp.lt.s32.totalorder %s5478_s17, %s5532_s5 }
 0x1bb   : > { %p3764_p11 = scmp.lt.s32.totalorder %s3762_s9, %s3758_s6 }
 0x1bc   : > { %p3760_p8 = pnand %p3759_p7, %p3878_p5 }
 0x1bd   : > { %p3765_p12 = por %p3764_p11, %p3763_p10 }
 0x1be   : > { %p3761_p9 = pneg %p3760_p8 }
 0x1c0   : > { %p3766_p13 = pnand %p3765_p12, %p3761_p9 }
 0x1c2   : > { %3769 = shalt.err (!%p3766_p13)
}
 0x1c3   : > { %s3808_s12 = smov 128   ;;  %s3809_s13 = smov 8  }
 0x1c4   : > { %3696 = dma.vmem_to_hbm [thread:$0]  (%p3878_p5), %s5480_s14, 256, %s5478_s17, %s5487_s22, %s3808_s12, %s3808_s12, %s3809_s13  }
 0x1c5 PF: > { %p3702_p0 = scmp.ge.s32.totalorder %s3804_s21, 2  ;;  %s3018_s15 = sand.u32 1, %s3792_s18  }
 0x1c6   : > { %s3019_s16 = scalar_lea.sflag [#allocation3], %s3018_s15 }
 0x1c7   : > { %p3699_p1 = pnand %p3702_p0, %p3882_p6 }
 0x1c9   : > { %p3700_p2 = pneg %p3699_p1 }
 0x1cb   : > { %3787 = dma.done.wait (%p3700_p2), %s3019_s16, 256  }
 0x1cc   : > { %3789 = vsyncadd (%p3700_p2), %s3019_s16, 4294967040  ;;  %p15_p3 = scmp.ge.s32.totalorder %s3865_s24, 4   ;;  %s5680_s18 = smov %s3796_s19 }
 0x1cd   : > { %s5681_s19 = smov %s3800_s20  ;;  %s5682_s20 = smov %s3876_s27 }
 0x1ce   : > { %s5683_s21 = smov %s3865_s24  ;;  %17 = sbr.rel (!%p15_p3) target bundleno = 3 (0x3), region = 81 }
 0x1d3   :  { %3024 = vsyncpa [#allocation3], 1 }
 0x1d4   :  { %3026 = vsyncpa [#allocation3 + $0x1], 1 }

</bundles_post_ra>
